<compile_context>
chip_gen: v7x
topology: tpu7x:2x2x1
jax: 0.10.0
libtpu: 0.0.40
codegen_flags: <defaults>
</compile_context>

<pallas_src>
import jax
import jax.numpy as jnp
import numpy as np
from jax.experimental import pallas as pl
from jax.experimental.pallas import tpu as pltpu

# ----------------------------- config (small) ------------------------------
VOCAB = 32     # vocab_size
EMB   = 16     # embedding_dim
HID   = 32     # hidden_dim
BATCH = 2
SEQ   = 8


# ------------------------ fused single-call kernel --------------------------
def fused_kernel(ids_ref,                     # SMEM (B, T) int32   (scalar prefetch)
                 emb_ref,                     # (VOCAB, E)
                 w0_ref, b0_ref,              # (E+H, 4H), (1, 4H)   layer 0 fused [wih; whh]
                 w1_ref, b1_ref,              # (2H,  4H), (1, 4H)   layer 1 fused [wih; whh]
                 wlin_ref, blin_ref,          # (H, V), (1, V)
                 logits_ref, hN_ref, cN_ref): # (B*T, V), (2, B, H), (2, B, H)
    B, T = ids_ref.shape
    H = w1_ref.shape[0] // 2

    # hoist weight loads out of the time loop (JAX does not CSE these)
    w0 = w0_ref[...]
    b0 = b0_ref[...]
    w1 = w1_ref[...]
    b1 = b1_ref[...]

    def cell(xh, c, w, b):
        # single fused matmul per cell: (B, in+H) @ (in+H, 4H)
        gates = jnp.dot(xh, w, preferred_element_type=jnp.float32) + b   # (B, 4H)
        # two full-width EUP passes, then static lane slices (PyTorch gate order i,f,g,o)
        sg = jax.nn.sigmoid(gates)
        th = jnp.tanh(gates)
        i = sg[:, 0 * H:1 * H]
        f = sg[:, 1 * H:2 * H]
        g = th[:, 2 * H:3 * H]
        o = sg[:, 3 * H:4 * H]
        c_new = f * c + i * g
        h_new = o * jnp.tanh(c_new)
        return h_new, c_new

    # zero initial state (matches the hidden=None path of the PyTorch module)
    zeros = jnp.zeros((B, H), jnp.float32)
    h0, c0, h1, c1 = zeros, zeros, zeros, zeros

    outs = []
    for t in range(T):                          # fully unrolled (T is static, tiny)
        # embedding gather: scalar token id from SMEM -> dynamic row of VMEM table
        rows = [emb_ref[pl.ds(ids_ref[b, t], 1), :] for b in range(B)]
        x_t = jnp.concatenate(rows, axis=0)                       # (B, E)
        h0, c0 = cell(jnp.concatenate([x_t, h0], axis=-1), c0, w0, b0)
        h1, c1 = cell(jnp.concatenate([h0, h1], axis=-1), c1, w1, b1)
        outs.append(h1)

    # build the (B*T, H) slab in batch-major (row = b*T + t) order, matching
    # output.contiguous().view(batch*seq, -1) of the batch_first PyTorch LSTM
    flat = jnp.concatenate([outs[t][b:b + 1, :]
                            for b in range(B) for t in range(T)], axis=0)

    logits_ref[...] = (jnp.dot(flat, wlin_ref[...],
                               preferred_element_type=jnp.float32)
                       + blin_ref[...])
    hN_ref[0] = h0
    hN_ref[1] = h1
    cN_ref[0] = c0
    cN_ref[1] = c1


def my_model_forward(params, input_ids):
    """input_ids: (B, T) int32. Returns (logits (B*T, VOCAB), (h_n, c_n))."""
    B, T = input_ids.shape
    # fuse the per-cell input/hidden matmuls: W = [wih; whh] -> (in+H, 4H)
    w0 = jnp.concatenate([params["wih0"], params["whh0"]], axis=0)   # (E+H, 4H)
    w1 = jnp.concatenate([params["wih1"], params["whh1"]], axis=0)   # (2H, 4H)

    full = lambda shp: pl.BlockSpec(shp, lambda i, ids: (0,) * len(shp))

    logits, h_n, c_n = pl.pallas_call(
        fused_kernel,
        out_shape=(jax.ShapeDtypeStruct((B * T, VOCAB), jnp.float32),
                   jax.ShapeDtypeStruct((2, B, HID), jnp.float32),
                   jax.ShapeDtypeStruct((2, B, HID), jnp.float32)),
        grid_spec=pltpu.PrefetchScalarGridSpec(
            num_scalar_prefetch=1,            # input_ids -> SMEM
            grid=(1,),                        # single invocation: no per-step overhead
            in_specs=[full(params["emb"].shape),
                      full(w0.shape), full(params["b0"].shape),
                      full(w1.shape), full(params["b1"].shape),
                      full(params["wlin"].shape), full(params["blin"].shape)],
            out_specs=[full((B * T, VOCAB)),
                       full((2, B, HID)),
                       full((2, B, HID))]),
        compiler_params=pltpu.CompilerParams(
            dimension_semantics=("arbitrary",)),
    )(input_ids, params["emb"], w0, params["b0"], w1, params["b1"],
      params["wlin"], params["blin"])
    return logits, (h_n, c_n)


# --------------------------------- params -----------------------------------
def init_params(key):
    ks = jax.random.split(key, 12)
    s = 0.1
    p = {}
    p["emb"]  = s * jax.random.normal(ks[0], (VOCAB, EMB), jnp.float32)
    # LSTM layer 0 (EMB -> HID); weights stored transposed: (in, 4H)
    p["wih0"] = s * jax.random.normal(ks[1], (EMB, 4 * HID), jnp.float32)
    p["whh0"] = s * jax.random.normal(ks[2], (HID, 4 * HID), jnp.float32)
    p["b0"]   = (s * jax.random.normal(ks[3], (1, 4 * HID), jnp.float32)
                 + s * jax.random.normal(ks[4], (1, 4 * HID), jnp.float32))
    # LSTM layer 1 (HID -> HID)
    p["wih1"] = s * jax.random.normal(ks[5], (HID, 4 * HID), jnp.float32)
    p["whh1"] = s * jax.random.normal(ks[6], (HID, 4 * HID), jnp.float32)
    p["b1"]   = (s * jax.random.normal(ks[7], (1, 4 * HID), jnp.float32)
                 + s * jax.random.normal(ks[8], (1, 4 * HID), jnp.float32))
    # Linear HID -> VOCAB (stored transposed)
    p["wlin"] = s * jax.random.normal(ks[9], (HID, VOCAB), jnp.float32)
    p["blin"] = s * jax.random.normal(ks[10], (1, VOCAB), jnp.float32)
    return p


# ----------------------------- pure-JAX reference ---------------------------
def reference_forward(params, input_ids):
    B, T = input_ids.shape
    embeds = jnp.take(params["emb"], input_ids, axis=0)        # (B, T, E)

    def cell(x, h, c, wih, whh, b):
        gates = x @ wih + h @ whh + b
        i = jax.nn.sigmoid(gates[:, 0 * HID:1 * HID])
        f = jax.nn.sigmoid(gates[:, 1 * HID:2 * HID])
        g = jnp.tanh(gates[:, 2 * HID:3 * HID])
        o = jax.nn.sigmoid(gates[:, 3 * HID:4 * HID])
        c = f * c + i * g
        h = o * jnp.tanh(c)
        return h, c

    h0 = jnp.zeros((B, HID)); c0 = jnp.zeros((B, HID))
    h1 = jnp.zeros((B, HID)); c1 = jnp.zeros((B, HID))
    outs = []
    for t in range(T):
        x_t = embeds[:, t, :]
        h0, c0 = cell(x_t, h0, c0, params["wih0"], params["whh0"], params["b0"])
        h1, c1 = cell(h0, h1, c1, params["wih1"], params["whh1"], params["b1"])
        outs.append(h1)
    out = jnp.stack(outs, axis=1).reshape(B * T, HID)
    logits = out @ params["wlin"] + params["blin"]
    h_n = jnp.stack([h0, h1], axis=0)
    c_n = jnp.stack([c0, c1], axis=0)
    return logits, (h_n, c_n)


# ------------------------------------ main ----------------------------------
if __name__ == "__main__":
    key = jax.random.PRNGKey(0)
    pkey, ikey = jax.random.split(key)
    params = init_params(pkey)
    input_ids = jax.random.randint(ikey, (BATCH, SEQ), 0, VOCAB, dtype=jnp.int32)

    logits, (h_n, c_n) = my_model_forward(params, input_ids)
    jax.block_until_ready((logits, h_n, c_n))

    ref_logits, (ref_h, ref_c) = reference_forward(params, input_ids)
    assert logits.shape == (BATCH * SEQ, VOCAB)
    assert h_n.shape == (2, BATCH, HID) and c_n.shape == (2, BATCH, HID)
    np.testing.assert_allclose(np.asarray(logits), np.asarray(ref_logits),
                               rtol=1e-5, atol=1e-5)
    np.testing.assert_allclose(np.asarray(h_n), np.asarray(ref_h),
                               rtol=1e-5, atol=1e-5)
    np.testing.assert_allclose(np.asarray(c_n), np.asarray(ref_c),
                               rtol=1e-5, atol=1e-5)
    print("KERNEL_OK")
</pallas_src>

<mosaic_0001>
module attributes {stable_mosaic.version = 11 : i64} {
  func.func @fused_kernel(%arg0: i32, %arg1: memref<2x8xi32, #tpu.memory_space<smem>>, %arg2: memref<32x16xf32, #tpu.memory_space<vmem>>, %arg3: memref<48x128xf32, #tpu.memory_space<vmem>>, %arg4: memref<1x128xf32, #tpu.memory_space<vmem>>, %arg5: memref<64x128xf32, #tpu.memory_space<vmem>>, %arg6: memref<1x128xf32, #tpu.memory_space<vmem>>, %arg7: memref<32x32xf32, #tpu.memory_space<vmem>>, %arg8: memref<1x32xf32, #tpu.memory_space<vmem>>, %arg9: memref<16x32xf32, #tpu.memory_space<vmem>>, %arg10: memref<2x2x32xf32, #tpu.memory_space<vmem>>, %arg11: memref<2x2x32xf32, #tpu.memory_space<vmem>>) attributes {dimension_semantics = [#tpu.dimension_semantics<arbitrary>], iteration_bounds = array<i64: 1>, scalar_prefetch = 1 : i64, scratch_operands = 0 : i64, tpu.core_type = #tpu.core_type<tc>, window_params = [{pipeline_mode = #tpu.pipeline_mode<synchronous>, transform_indices = @transform_0, window_bounds = array<i64: 32, 16>}, {pipeline_mode = #tpu.pipeline_mode<synchronous>, transform_indices = @transform_1, window_bounds = array<i64: 48, 128>}, {pipeline_mode = #tpu.pipeline_mode<synchronous>, transform_indices = @transform_2, window_bounds = array<i64: 1, 128>}, {pipeline_mode = #tpu.pipeline_mode<synchronous>, transform_indices = @transform_3, window_bounds = array<i64: 64, 128>}, {pipeline_mode = #tpu.pipeline_mode<synchronous>, transform_indices = @transform_4, window_bounds = array<i64: 1, 128>}, {pipeline_mode = #tpu.pipeline_mode<synchronous>, transform_indices = @transform_5, window_bounds = array<i64: 32, 32>}, {pipeline_mode = #tpu.pipeline_mode<synchronous>, transform_indices = @transform_6, window_bounds = array<i64: 1, 32>}, {pipeline_mode = #tpu.pipeline_mode<synchronous>, transform_indices = @transform_7, window_bounds = array<i64: 16, 32>}, {pipeline_mode = #tpu.pipeline_mode<synchronous>, transform_indices = @transform_8, window_bounds = array<i64: 2, 2, 32>}, {pipeline_mode = #tpu.pipeline_mode<synchronous>, transform_indices = @transform_9, window_bounds = array<i64: 2, 2, 32>}]} {
    %c0 = arith.constant 0 : index
    %c0_0 = arith.constant 0 : index
    %0 = vector.load %arg3[%c0, %c0_0] : memref<48x128xf32, #tpu.memory_space<vmem>>, vector<48x128xf32>
    %c0_1 = arith.constant 0 : index
    %c0_2 = arith.constant 0 : index
    %1 = vector.load %arg4[%c0_1, %c0_2] : memref<1x128xf32, #tpu.memory_space<vmem>>, vector<1x128xf32>
    %c0_3 = arith.constant 0 : index
    %c0_4 = arith.constant 0 : index
    %2 = vector.load %arg5[%c0_3, %c0_4] : memref<64x128xf32, #tpu.memory_space<vmem>>, vector<64x128xf32>
    %c0_5 = arith.constant 0 : index
    %c0_6 = arith.constant 0 : index
    %3 = vector.load %arg6[%c0_5, %c0_6] : memref<1x128xf32, #tpu.memory_space<vmem>>, vector<1x128xf32>
    %cst = arith.constant 0.000000e+00 : f32
    %4 = vector.broadcast %cst : f32 to vector<2x32xf32>
    %c0_7 = arith.constant 0 : index
    %c0_8 = arith.constant 0 : index
    %5 = memref.load %arg1[%c0_7, %c0_8] : memref<2x8xi32, #tpu.memory_space<smem>>
    %6 = arith.index_cast %5 : i32 to index
    %c0_9 = arith.constant 0 : index
    %7 = vector.load %arg2[%6, %c0_9] : memref<32x16xf32, #tpu.memory_space<vmem>>, vector<1x16xf32>
    %c1 = arith.constant 1 : index
    %c0_10 = arith.constant 0 : index
    %8 = memref.load %arg1[%c1, %c0_10] : memref<2x8xi32, #tpu.memory_space<smem>>
    %9 = arith.index_cast %8 : i32 to index
    %c0_11 = arith.constant 0 : index
    %10 = vector.load %arg2[%9, %c0_11] : memref<32x16xf32, #tpu.memory_space<vmem>>, vector<1x16xf32>
    %11 = tpu.concatenate %7, %10 in 0 : vector<1x16xf32>, vector<1x16xf32> -> vector<2x16xf32>
    %12 = tpu.concatenate %11, %4 in 1 : vector<2x16xf32>, vector<2x32xf32> -> vector<2x48xf32>
    %cst_12 = arith.constant dense<0.000000e+00> : vector<2x128xf32>
    %13 = tpu.matmul %12, %0, %cst_12 {dimension_numbers = #tpu.dot_dimension_numbers<[1], [0], [0], [1], [0, 0, 1, 1], [], []>} : vector<2x48xf32>, vector<48x128xf32>, vector<2x128xf32> -> vector<2x128xf32>
    %14 = vector.broadcast %1 : vector<1x128xf32> to vector<2x128xf32>
    %15 = arith.addf %13, %14 : vector<2x128xf32>
    %16 = arith.negf %15 : vector<2x128xf32>
    %17 = math.exp %16 : vector<2x128xf32>
    %cst_13 = arith.constant 1.000000e+00 : f32
    %18 = vector.broadcast %cst_13 : f32 to vector<2x128xf32>
    %19 = arith.addf %18, %17 : vector<2x128xf32>
    %20 = arith.divf %18, %19 : vector<2x128xf32>
    %21 = math.tanh %15 : vector<2x128xf32>
    %22 = vector.extract_strided_slice %20 {offsets = [0, 0], sizes = [2, 32], strides = [1, 1]} : vector<2x128xf32> to vector<2x32xf32>
    %23 = vector.extract_strided_slice %20 {offsets = [0, 32], sizes = [2, 32], strides = [1, 1]} : vector<2x128xf32> to vector<2x32xf32>
    %24 = vector.extract_strided_slice %21 {offsets = [0, 64], sizes = [2, 32], strides = [1, 1]} : vector<2x128xf32> to vector<2x32xf32>
    %25 = vector.extract_strided_slice %20 {offsets = [0, 96], sizes = [2, 32], strides = [1, 1]} : vector<2x128xf32> to vector<2x32xf32>
    %26 = arith.mulf %23, %4 : vector<2x32xf32>
    %27 = arith.mulf %22, %24 : vector<2x32xf32>
    %28 = arith.addf %26, %27 : vector<2x32xf32>
    %29 = math.tanh %28 : vector<2x32xf32>
    %30 = arith.mulf %25, %29 : vector<2x32xf32>
    %31 = tpu.concatenate %30, %4 in 1 : vector<2x32xf32>, vector<2x32xf32> -> vector<2x64xf32>
    %cst_14 = arith.constant dense<0.000000e+00> : vector<2x128xf32>
    %32 = tpu.matmul %31, %2, %cst_14 {dimension_numbers = #tpu.dot_dimension_numbers<[1], [0], [0], [1], [0, 0, 1, 1], [], []>} : vector<2x64xf32>, vector<64x128xf32>, vector<2x128xf32> -> vector<2x128xf32>
    %33 = vector.broadcast %3 : vector<1x128xf32> to vector<2x128xf32>
    %34 = arith.addf %32, %33 : vector<2x128xf32>
    %35 = arith.negf %34 : vector<2x128xf32>
    %36 = math.exp %35 : vector<2x128xf32>
    %cst_15 = arith.constant 1.000000e+00 : f32
    %37 = vector.broadcast %cst_15 : f32 to vector<2x128xf32>
    %38 = arith.addf %37, %36 : vector<2x128xf32>
    %39 = arith.divf %37, %38 : vector<2x128xf32>
    %40 = math.tanh %34 : vector<2x128xf32>
    %41 = vector.extract_strided_slice %39 {offsets = [0, 0], sizes = [2, 32], strides = [1, 1]} : vector<2x128xf32> to vector<2x32xf32>
    %42 = vector.extract_strided_slice %39 {offsets = [0, 32], sizes = [2, 32], strides = [1, 1]} : vector<2x128xf32> to vector<2x32xf32>
    %43 = vector.extract_strided_slice %40 {offsets = [0, 64], sizes = [2, 32], strides = [1, 1]} : vector<2x128xf32> to vector<2x32xf32>
    %44 = vector.extract_strided_slice %39 {offsets = [0, 96], sizes = [2, 32], strides = [1, 1]} : vector<2x128xf32> to vector<2x32xf32>
    %45 = arith.mulf %42, %4 : vector<2x32xf32>
    %46 = arith.mulf %41, %43 : vector<2x32xf32>
    %47 = arith.addf %45, %46 : vector<2x32xf32>
    %48 = math.tanh %47 : vector<2x32xf32>
    %49 = arith.mulf %44, %48 : vector<2x32xf32>
    %c0_16 = arith.constant 0 : index
    %c1_17 = arith.constant 1 : index
    %50 = memref.load %arg1[%c0_16, %c1_17] : memref<2x8xi32, #tpu.memory_space<smem>>
    %51 = arith.index_cast %50 : i32 to index
    %c0_18 = arith.constant 0 : index
    %52 = vector.load %arg2[%51, %c0_18] : memref<32x16xf32, #tpu.memory_space<vmem>>, vector<1x16xf32>
    %c1_19 = arith.constant 1 : index
    %c1_20 = arith.constant 1 : index
    %53 = memref.load %arg1[%c1_19, %c1_20] : memref<2x8xi32, #tpu.memory_space<smem>>
    %54 = arith.index_cast %53 : i32 to index
    %c0_21 = arith.constant 0 : index
    %55 = vector.load %arg2[%54, %c0_21] : memref<32x16xf32, #tpu.memory_space<vmem>>, vector<1x16xf32>
    %56 = tpu.concatenate %52, %55 in 0 : vector<1x16xf32>, vector<1x16xf32> -> vector<2x16xf32>
    %57 = tpu.concatenate %56, %30 in 1 : vector<2x16xf32>, vector<2x32xf32> -> vector<2x48xf32>
    %cst_22 = arith.constant dense<0.000000e+00> : vector<2x128xf32>
    %58 = tpu.matmul %57, %0, %cst_22 {dimension_numbers = #tpu.dot_dimension_numbers<[1], [0], [0], [1], [0, 0, 1, 1], [], []>} : vector<2x48xf32>, vector<48x128xf32>, vector<2x128xf32> -> vector<2x128xf32>
    %59 = vector.broadcast %1 : vector<1x128xf32> to vector<2x128xf32>
    %60 = arith.addf %58, %59 : vector<2x128xf32>
    %61 = arith.negf %60 : vector<2x128xf32>
    %62 = math.exp %61 : vector<2x128xf32>
    %cst_23 = arith.constant 1.000000e+00 : f32
    %63 = vector.broadcast %cst_23 : f32 to vector<2x128xf32>
    %64 = arith.addf %63, %62 : vector<2x128xf32>
    %65 = arith.divf %63, %64 : vector<2x128xf32>
    %66 = math.tanh %60 : vector<2x128xf32>
    %67 = vector.extract_strided_slice %65 {offsets = [0, 0], sizes = [2, 32], strides = [1, 1]} : vector<2x128xf32> to vector<2x32xf32>
    %68 = vector.extract_strided_slice %65 {offsets = [0, 32], sizes = [2, 32], strides = [1, 1]} : vector<2x128xf32> to vector<2x32xf32>
    %69 = vector.extract_strided_slice %66 {offsets = [0, 64], sizes = [2, 32], strides = [1, 1]} : vector<2x128xf32> to vector<2x32xf32>
    %70 = vector.extract_strided_slice %65 {offsets = [0, 96], sizes = [2, 32], strides = [1, 1]} : vector<2x128xf32> to vector<2x32xf32>
    %71 = arith.mulf %68, %28 : vector<2x32xf32>
    %72 = arith.mulf %67, %69 : vector<2x32xf32>
    %73 = arith.addf %71, %72 : vector<2x32xf32>
    %74 = math.tanh %73 : vector<2x32xf32>
    %75 = arith.mulf %70, %74 : vector<2x32xf32>
    %76 = tpu.concatenate %75, %49 in 1 : vector<2x32xf32>, vector<2x32xf32> -> vector<2x64xf32>
    %cst_24 = arith.constant dense<0.000000e+00> : vector<2x128xf32>
    %77 = tpu.matmul %76, %2, %cst_24 {dimension_numbers = #tpu.dot_dimension_numbers<[1], [0], [0], [1], [0, 0, 1, 1], [], []>} : vector<2x64xf32>, vector<64x128xf32>, vector<2x128xf32> -> vector<2x128xf32>
    %78 = vector.broadcast %3 : vector<1x128xf32> to vector<2x128xf32>
    %79 = arith.addf %77, %78 : vector<2x128xf32>
    %80 = arith.negf %79 : vector<2x128xf32>
    %81 = math.exp %80 : vector<2x128xf32>
    %cst_25 = arith.constant 1.000000e+00 : f32
    %82 = vector.broadcast %cst_25 : f32 to vector<2x128xf32>
    %83 = arith.addf %82, %81 : vector<2x128xf32>
    %84 = arith.divf %82, %83 : vector<2x128xf32>
    %85 = math.tanh %79 : vector<2x128xf32>
    %86 = vector.extract_strided_slice %84 {offsets = [0, 0], sizes = [2, 32], strides = [1, 1]} : vector<2x128xf32> to vector<2x32xf32>
    %87 = vector.extract_strided_slice %84 {offsets = [0, 32], sizes = [2, 32], strides = [1, 1]} : vector<2x128xf32> to vector<2x32xf32>
    %88 = vector.extract_strided_slice %85 {offsets = [0, 64], sizes = [2, 32], strides = [1, 1]} : vector<2x128xf32> to vector<2x32xf32>
    %89 = vector.extract_strided_slice %84 {offsets = [0, 96], sizes = [2, 32], strides = [1, 1]} : vector<2x128xf32> to vector<2x32xf32>
    %90 = arith.mulf %87, %47 : vector<2x32xf32>
    %91 = arith.mulf %86, %88 : vector<2x32xf32>
    %92 = arith.addf %90, %91 : vector<2x32xf32>
    %93 = math.tanh %92 : vector<2x32xf32>
    %94 = arith.mulf %89, %93 : vector<2x32xf32>
    %c0_26 = arith.constant 0 : index
    %c2 = arith.constant 2 : index
    %95 = memref.load %arg1[%c0_26, %c2] : memref<2x8xi32, #tpu.memory_space<smem>>
    %96 = arith.index_cast %95 : i32 to index
    %c0_27 = arith.constant 0 : index
    %97 = vector.load %arg2[%96, %c0_27] : memref<32x16xf32, #tpu.memory_space<vmem>>, vector<1x16xf32>
    %c1_28 = arith.constant 1 : index
    %c2_29 = arith.constant 2 : index
    %98 = memref.load %arg1[%c1_28, %c2_29] : memref<2x8xi32, #tpu.memory_space<smem>>
    %99 = arith.index_cast %98 : i32 to index
    %c0_30 = arith.constant 0 : index
    %100 = vector.load %arg2[%99, %c0_30] : memref<32x16xf32, #tpu.memory_space<vmem>>, vector<1x16xf32>
    %101 = tpu.concatenate %97, %100 in 0 : vector<1x16xf32>, vector<1x16xf32> -> vector<2x16xf32>
    %102 = tpu.concatenate %101, %75 in 1 : vector<2x16xf32>, vector<2x32xf32> -> vector<2x48xf32>
    %cst_31 = arith.constant dense<0.000000e+00> : vector<2x128xf32>
    %103 = tpu.matmul %102, %0, %cst_31 {dimension_numbers = #tpu.dot_dimension_numbers<[1], [0], [0], [1], [0, 0, 1, 1], [], []>} : vector<2x48xf32>, vector<48x128xf32>, vector<2x128xf32> -> vector<2x128xf32>
    %104 = vector.broadcast %1 : vector<1x128xf32> to vector<2x128xf32>
    %105 = arith.addf %103, %104 : vector<2x128xf32>
    %106 = arith.negf %105 : vector<2x128xf32>
    %107 = math.exp %106 : vector<2x128xf32>
    %cst_32 = arith.constant 1.000000e+00 : f32
    %108 = vector.broadcast %cst_32 : f32 to vector<2x128xf32>
    %109 = arith.addf %108, %107 : vector<2x128xf32>
    %110 = arith.divf %108, %109 : vector<2x128xf32>
    %111 = math.tanh %105 : vector<2x128xf32>
    %112 = vector.extract_strided_slice %110 {offsets = [0, 0], sizes = [2, 32], strides = [1, 1]} : vector<2x128xf32> to vector<2x32xf32>
    %113 = vector.extract_strided_slice %110 {offsets = [0, 32], sizes = [2, 32], strides = [1, 1]} : vector<2x128xf32> to vector<2x32xf32>
    %114 = vector.extract_strided_slice %111 {offsets = [0, 64], sizes = [2, 32], strides = [1, 1]} : vector<2x128xf32> to vector<2x32xf32>
    %115 = vector.extract_strided_slice %110 {offsets = [0, 96], sizes = [2, 32], strides = [1, 1]} : vector<2x128xf32> to vector<2x32xf32>
    %116 = arith.mulf %113, %73 : vector<2x32xf32>
    %117 = arith.mulf %112, %114 : vector<2x32xf32>
    %118 = arith.addf %116, %117 : vector<2x32xf32>
    %119 = math.tanh %118 : vector<2x32xf32>
    %120 = arith.mulf %115, %119 : vector<2x32xf32>
    %121 = tpu.concatenate %120, %94 in 1 : vector<2x32xf32>, vector<2x32xf32> -> vector<2x64xf32>
    %cst_33 = arith.constant dense<0.000000e+00> : vector<2x128xf32>
    %122 = tpu.matmul %121, %2, %cst_33 {dimension_numbers = #tpu.dot_dimension_numbers<[1], [0], [0], [1], [0, 0, 1, 1], [], []>} : vector<2x64xf32>, vector<64x128xf32>, vector<2x128xf32> -> vector<2x128xf32>
    %123 = vector.broadcast %3 : vector<1x128xf32> to vector<2x128xf32>
    %124 = arith.addf %122, %123 : vector<2x128xf32>
    %125 = arith.negf %124 : vector<2x128xf32>
    %126 = math.exp %125 : vector<2x128xf32>
    %cst_34 = arith.constant 1.000000e+00 : f32
    %127 = vector.broadcast %cst_34 : f32 to vector<2x128xf32>
    %128 = arith.addf %127, %126 : vector<2x128xf32>
    %129 = arith.divf %127, %128 : vector<2x128xf32>
    %130 = math.tanh %124 : vector<2x128xf32>
    %131 = vector.extract_strided_slice %129 {offsets = [0, 0], sizes = [2, 32], strides = [1, 1]} : vector<2x128xf32> to vector<2x32xf32>
    %132 = vector.extract_strided_slice %129 {offsets = [0, 32], sizes = [2, 32], strides = [1, 1]} : vector<2x128xf32> to vector<2x32xf32>
    %133 = vector.extract_strided_slice %130 {offsets = [0, 64], sizes = [2, 32], strides = [1, 1]} : vector<2x128xf32> to vector<2x32xf32>
    %134 = vector.extract_strided_slice %129 {offsets = [0, 96], sizes = [2, 32], strides = [1, 1]} : vector<2x128xf32> to vector<2x32xf32>
    %135 = arith.mulf %132, %92 : vector<2x32xf32>
    %136 = arith.mulf %131, %133 : vector<2x32xf32>
    %137 = arith.addf %135, %136 : vector<2x32xf32>
    %138 = math.tanh %137 : vector<2x32xf32>
    %139 = arith.mulf %134, %138 : vector<2x32xf32>
    %c0_35 = arith.constant 0 : index
    %c3 = arith.constant 3 : index
    %140 = memref.load %arg1[%c0_35, %c3] : memref<2x8xi32, #tpu.memory_space<smem>>
    %141 = arith.index_cast %140 : i32 to index
    %c0_36 = arith.constant 0 : index
    %142 = vector.load %arg2[%141, %c0_36] : memref<32x16xf32, #tpu.memory_space<vmem>>, vector<1x16xf32>
    %c1_37 = arith.constant 1 : index
    %c3_38 = arith.constant 3 : index
    %143 = memref.load %arg1[%c1_37, %c3_38] : memref<2x8xi32, #tpu.memory_space<smem>>
    %144 = arith.index_cast %143 : i32 to index
    %c0_39 = arith.constant 0 : index
    %145 = vector.load %arg2[%144, %c0_39] : memref<32x16xf32, #tpu.memory_space<vmem>>, vector<1x16xf32>
    %146 = tpu.concatenate %142, %145 in 0 : vector<1x16xf32>, vector<1x16xf32> -> vector<2x16xf32>
    %147 = tpu.concatenate %146, %120 in 1 : vector<2x16xf32>, vector<2x32xf32> -> vector<2x48xf32>
    %cst_40 = arith.constant dense<0.000000e+00> : vector<2x128xf32>
    %148 = tpu.matmul %147, %0, %cst_40 {dimension_numbers = #tpu.dot_dimension_numbers<[1], [0], [0], [1], [0, 0, 1, 1], [], []>} : vector<2x48xf32>, vector<48x128xf32>, vector<2x128xf32> -> vector<2x128xf32>
    %149 = vector.broadcast %1 : vector<1x128xf32> to vector<2x128xf32>
    %150 = arith.addf %148, %149 : vector<2x128xf32>
    %151 = arith.negf %150 : vector<2x128xf32>
    %152 = math.exp %151 : vector<2x128xf32>
    %cst_41 = arith.constant 1.000000e+00 : f32
    %153 = vector.broadcast %cst_41 : f32 to vector<2x128xf32>
    %154 = arith.addf %153, %152 : vector<2x128xf32>
    %155 = arith.divf %153, %154 : vector<2x128xf32>
    %156 = math.tanh %150 : vector<2x128xf32>
    %157 = vector.extract_strided_slice %155 {offsets = [0, 0], sizes = [2, 32], strides = [1, 1]} : vector<2x128xf32> to vector<2x32xf32>
    %158 = vector.extract_strided_slice %155 {offsets = [0, 32], sizes = [2, 32], strides = [1, 1]} : vector<2x128xf32> to vector<2x32xf32>
    %159 = vector.extract_strided_slice %156 {offsets = [0, 64], sizes = [2, 32], strides = [1, 1]} : vector<2x128xf32> to vector<2x32xf32>
    %160 = vector.extract_strided_slice %155 {offsets = [0, 96], sizes = [2, 32], strides = [1, 1]} : vector<2x128xf32> to vector<2x32xf32>
    %161 = arith.mulf %158, %118 : vector<2x32xf32>
    %162 = arith.mulf %157, %159 : vector<2x32xf32>
    %163 = arith.addf %161, %162 : vector<2x32xf32>
    %164 = math.tanh %163 : vector<2x32xf32>
    %165 = arith.mulf %160, %164 : vector<2x32xf32>
    %166 = tpu.concatenate %165, %139 in 1 : vector<2x32xf32>, vector<2x32xf32> -> vector<2x64xf32>
    %cst_42 = arith.constant dense<0.000000e+00> : vector<2x128xf32>
    %167 = tpu.matmul %166, %2, %cst_42 {dimension_numbers = #tpu.dot_dimension_numbers<[1], [0], [0], [1], [0, 0, 1, 1], [], []>} : vector<2x64xf32>, vector<64x128xf32>, vector<2x128xf32> -> vector<2x128xf32>
    %168 = vector.broadcast %3 : vector<1x128xf32> to vector<2x128xf32>
    %169 = arith.addf %167, %168 : vector<2x128xf32>
    %170 = arith.negf %169 : vector<2x128xf32>
    %171 = math.exp %170 : vector<2x128xf32>
    %cst_43 = arith.constant 1.000000e+00 : f32
    %172 = vector.broadcast %cst_43 : f32 to vector<2x128xf32>
    %173 = arith.addf %172, %171 : vector<2x128xf32>
    %174 = arith.divf %172, %173 : vector<2x128xf32>
    %175 = math.tanh %169 : vector<2x128xf32>
    %176 = vector.extract_strided_slice %174 {offsets = [0, 0], sizes = [2, 32], strides = [1, 1]} : vector<2x128xf32> to vector<2x32xf32>
    %177 = vector.extract_strided_slice %174 {offsets = [0, 32], sizes = [2, 32], strides = [1, 1]} : vector<2x128xf32> to vector<2x32xf32>
    %178 = vector.extract_strided_slice %175 {offsets = [0, 64], sizes = [2, 32], strides = [1, 1]} : vector<2x128xf32> to vector<2x32xf32>
    %179 = vector.extract_strided_slice %174 {offsets = [0, 96], sizes = [2, 32], strides = [1, 1]} : vector<2x128xf32> to vector<2x32xf32>
    %180 = arith.mulf %177, %137 : vector<2x32xf32>
    %181 = arith.mulf %176, %178 : vector<2x32xf32>
    %182 = arith.addf %180, %181 : vector<2x32xf32>
    %183 = math.tanh %182 : vector<2x32xf32>
    %184 = arith.mulf %179, %183 : vector<2x32xf32>
    %c0_44 = arith.constant 0 : index
    %c4 = arith.constant 4 : index
    %185 = memref.load %arg1[%c0_44, %c4] : memref<2x8xi32, #tpu.memory_space<smem>>
    %186 = arith.index_cast %185 : i32 to index
    %c0_45 = arith.constant 0 : index
    %187 = vector.load %arg2[%186, %c0_45] : memref<32x16xf32, #tpu.memory_space<vmem>>, vector<1x16xf32>
    %c1_46 = arith.constant 1 : index
    %c4_47 = arith.constant 4 : index
    %188 = memref.load %arg1[%c1_46, %c4_47] : memref<2x8xi32, #tpu.memory_space<smem>>
    %189 = arith.index_cast %188 : i32 to index
    %c0_48 = arith.constant 0 : index
    %190 = vector.load %arg2[%189, %c0_48] : memref<32x16xf32, #tpu.memory_space<vmem>>, vector<1x16xf32>
    %191 = tpu.concatenate %187, %190 in 0 : vector<1x16xf32>, vector<1x16xf32> -> vector<2x16xf32>
    %192 = tpu.concatenate %191, %165 in 1 : vector<2x16xf32>, vector<2x32xf32> -> vector<2x48xf32>
    %cst_49 = arith.constant dense<0.000000e+00> : vector<2x128xf32>
    %193 = tpu.matmul %192, %0, %cst_49 {dimension_numbers = #tpu.dot_dimension_numbers<[1], [0], [0], [1], [0, 0, 1, 1], [], []>} : vector<2x48xf32>, vector<48x128xf32>, vector<2x128xf32> -> vector<2x128xf32>
    %194 = vector.broadcast %1 : vector<1x128xf32> to vector<2x128xf32>
    %195 = arith.addf %193, %194 : vector<2x128xf32>
    %196 = arith.negf %195 : vector<2x128xf32>
    %197 = math.exp %196 : vector<2x128xf32>
    %cst_50 = arith.constant 1.000000e+00 : f32
    %198 = vector.broadcast %cst_50 : f32 to vector<2x128xf32>
    %199 = arith.addf %198, %197 : vector<2x128xf32>
    %200 = arith.divf %198, %199 : vector<2x128xf32>
    %201 = math.tanh %195 : vector<2x128xf32>
    %202 = vector.extract_strided_slice %200 {offsets = [0, 0], sizes = [2, 32], strides = [1, 1]} : vector<2x128xf32> to vector<2x32xf32>
    %203 = vector.extract_strided_slice %200 {offsets = [0, 32], sizes = [2, 32], strides = [1, 1]} : vector<2x128xf32> to vector<2x32xf32>
    %204 = vector.extract_strided_slice %201 {offsets = [0, 64], sizes = [2, 32], strides = [1, 1]} : vector<2x128xf32> to vector<2x32xf32>
    %205 = vector.extract_strided_slice %200 {offsets = [0, 96], sizes = [2, 32], strides = [1, 1]} : vector<2x128xf32> to vector<2x32xf32>
    %206 = arith.mulf %203, %163 : vector<2x32xf32>
    %207 = arith.mulf %202, %204 : vector<2x32xf32>
    %208 = arith.addf %206, %207 : vector<2x32xf32>
    %209 = math.tanh %208 : vector<2x32xf32>
    %210 = arith.mulf %205, %209 : vector<2x32xf32>
    %211 = tpu.concatenate %210, %184 in 1 : vector<2x32xf32>, vector<2x32xf32> -> vector<2x64xf32>
    %cst_51 = arith.constant dense<0.000000e+00> : vector<2x128xf32>
    %212 = tpu.matmul %211, %2, %cst_51 {dimension_numbers = #tpu.dot_dimension_numbers<[1], [0], [0], [1], [0, 0, 1, 1], [], []>} : vector<2x64xf32>, vector<64x128xf32>, vector<2x128xf32> -> vector<2x128xf32>
    %213 = vector.broadcast %3 : vector<1x128xf32> to vector<2x128xf32>
    %214 = arith.addf %212, %213 : vector<2x128xf32>
    %215 = arith.negf %214 : vector<2x128xf32>
    %216 = math.exp %215 : vector<2x128xf32>
    %cst_52 = arith.constant 1.000000e+00 : f32
    %217 = vector.broadcast %cst_52 : f32 to vector<2x128xf32>
    %218 = arith.addf %217, %216 : vector<2x128xf32>
    %219 = arith.divf %217, %218 : vector<2x128xf32>
    %220 = math.tanh %214 : vector<2x128xf32>
    %221 = vector.extract_strided_slice %219 {offsets = [0, 0], sizes = [2, 32], strides = [1, 1]} : vector<2x128xf32> to vector<2x32xf32>
    %222 = vector.extract_strided_slice %219 {offsets = [0, 32], sizes = [2, 32], strides = [1, 1]} : vector<2x128xf32> to vector<2x32xf32>
    %223 = vector.extract_strided_slice %220 {offsets = [0, 64], sizes = [2, 32], strides = [1, 1]} : vector<2x128xf32> to vector<2x32xf32>
    %224 = vector.extract_strided_slice %219 {offsets = [0, 96], sizes = [2, 32], strides = [1, 1]} : vector<2x128xf32> to vector<2x32xf32>
    %225 = arith.mulf %222, %182 : vector<2x32xf32>
    %226 = arith.mulf %221, %223 : vector<2x32xf32>
    %227 = arith.addf %225, %226 : vector<2x32xf32>
    %228 = math.tanh %227 : vector<2x32xf32>
    %229 = arith.mulf %224, %228 : vector<2x32xf32>
    %c0_53 = arith.constant 0 : index
    %c5 = arith.constant 5 : index
    %230 = memref.load %arg1[%c0_53, %c5] : memref<2x8xi32, #tpu.memory_space<smem>>
    %231 = arith.index_cast %230 : i32 to index
    %c0_54 = arith.constant 0 : index
    %232 = vector.load %arg2[%231, %c0_54] : memref<32x16xf32, #tpu.memory_space<vmem>>, vector<1x16xf32>
    %c1_55 = arith.constant 1 : index
    %c5_56 = arith.constant 5 : index
    %233 = memref.load %arg1[%c1_55, %c5_56] : memref<2x8xi32, #tpu.memory_space<smem>>
    %234 = arith.index_cast %233 : i32 to index
    %c0_57 = arith.constant 0 : index
    %235 = vector.load %arg2[%234, %c0_57] : memref<32x16xf32, #tpu.memory_space<vmem>>, vector<1x16xf32>
    %236 = tpu.concatenate %232, %235 in 0 : vector<1x16xf32>, vector<1x16xf32> -> vector<2x16xf32>
    %237 = tpu.concatenate %236, %210 in 1 : vector<2x16xf32>, vector<2x32xf32> -> vector<2x48xf32>
    %cst_58 = arith.constant dense<0.000000e+00> : vector<2x128xf32>
    %238 = tpu.matmul %237, %0, %cst_58 {dimension_numbers = #tpu.dot_dimension_numbers<[1], [0], [0], [1], [0, 0, 1, 1], [], []>} : vector<2x48xf32>, vector<48x128xf32>, vector<2x128xf32> -> vector<2x128xf32>
    %239 = vector.broadcast %1 : vector<1x128xf32> to vector<2x128xf32>
    %240 = arith.addf %238, %239 : vector<2x128xf32>
    %241 = arith.negf %240 : vector<2x128xf32>
    %242 = math.exp %241 : vector<2x128xf32>
    %cst_59 = arith.constant 1.000000e+00 : f32
    %243 = vector.broadcast %cst_59 : f32 to vector<2x128xf32>
    %244 = arith.addf %243, %242 : vector<2x128xf32>
    %245 = arith.divf %243, %244 : vector<2x128xf32>
    %246 = math.tanh %240 : vector<2x128xf32>
    %247 = vector.extract_strided_slice %245 {offsets = [0, 0], sizes = [2, 32], strides = [1, 1]} : vector<2x128xf32> to vector<2x32xf32>
    %248 = vector.extract_strided_slice %245 {offsets = [0, 32], sizes = [2, 32], strides = [1, 1]} : vector<2x128xf32> to vector<2x32xf32>
    %249 = vector.extract_strided_slice %246 {offsets = [0, 64], sizes = [2, 32], strides = [1, 1]} : vector<2x128xf32> to vector<2x32xf32>
    %250 = vector.extract_strided_slice %245 {offsets = [0, 96], sizes = [2, 32], strides = [1, 1]} : vector<2x128xf32> to vector<2x32xf32>
    %251 = arith.mulf %248, %208 : vector<2x32xf32>
    %252 = arith.mulf %247, %249 : vector<2x32xf32>
    %253 = arith.addf %251, %252 : vector<2x32xf32>
    %254 = math.tanh %253 : vector<2x32xf32>
    %255 = arith.mulf %250, %254 : vector<2x32xf32>
    %256 = tpu.concatenate %255, %229 in 1 : vector<2x32xf32>, vector<2x32xf32> -> vector<2x64xf32>
    %cst_60 = arith.constant dense<0.000000e+00> : vector<2x128xf32>
    %257 = tpu.matmul %256, %2, %cst_60 {dimension_numbers = #tpu.dot_dimension_numbers<[1], [0], [0], [1], [0, 0, 1, 1], [], []>} : vector<2x64xf32>, vector<64x128xf32>, vector<2x128xf32> -> vector<2x128xf32>
    %258 = vector.broadcast %3 : vector<1x128xf32> to vector<2x128xf32>
    %259 = arith.addf %257, %258 : vector<2x128xf32>
    %260 = arith.negf %259 : vector<2x128xf32>
    %261 = math.exp %260 : vector<2x128xf32>
    %cst_61 = arith.constant 1.000000e+00 : f32
    %262 = vector.broadcast %cst_61 : f32 to vector<2x128xf32>
    %263 = arith.addf %262, %261 : vector<2x128xf32>
    %264 = arith.divf %262, %263 : vector<2x128xf32>
    %265 = math.tanh %259 : vector<2x128xf32>
    %266 = vector.extract_strided_slice %264 {offsets = [0, 0], sizes = [2, 32], strides = [1, 1]} : vector<2x128xf32> to vector<2x32xf32>
    %267 = vector.extract_strided_slice %264 {offsets = [0, 32], sizes = [2, 32], strides = [1, 1]} : vector<2x128xf32> to vector<2x32xf32>
    %268 = vector.extract_strided_slice %265 {offsets = [0, 64], sizes = [2, 32], strides = [1, 1]} : vector<2x128xf32> to vector<2x32xf32>
    %269 = vector.extract_strided_slice %264 {offsets = [0, 96], sizes = [2, 32], strides = [1, 1]} : vector<2x128xf32> to vector<2x32xf32>
    %270 = arith.mulf %267, %227 : vector<2x32xf32>
    %271 = arith.mulf %266, %268 : vector<2x32xf32>
    %272 = arith.addf %270, %271 : vector<2x32xf32>
    %273 = math.tanh %272 : vector<2x32xf32>
    %274 = arith.mulf %269, %273 : vector<2x32xf32>
    %c0_62 = arith.constant 0 : index
    %c6 = arith.constant 6 : index
    %275 = memref.load %arg1[%c0_62, %c6] : memref<2x8xi32, #tpu.memory_space<smem>>
    %276 = arith.index_cast %275 : i32 to index
    %c0_63 = arith.constant 0 : index
    %277 = vector.load %arg2[%276, %c0_63] : memref<32x16xf32, #tpu.memory_space<vmem>>, vector<1x16xf32>
    %c1_64 = arith.constant 1 : index
    %c6_65 = arith.constant 6 : index
    %278 = memref.load %arg1[%c1_64, %c6_65] : memref<2x8xi32, #tpu.memory_space<smem>>
    %279 = arith.index_cast %278 : i32 to index
    %c0_66 = arith.constant 0 : index
    %280 = vector.load %arg2[%279, %c0_66] : memref<32x16xf32, #tpu.memory_space<vmem>>, vector<1x16xf32>
    %281 = tpu.concatenate %277, %280 in 0 : vector<1x16xf32>, vector<1x16xf32> -> vector<2x16xf32>
    %282 = tpu.concatenate %281, %255 in 1 : vector<2x16xf32>, vector<2x32xf32> -> vector<2x48xf32>
    %cst_67 = arith.constant dense<0.000000e+00> : vector<2x128xf32>
    %283 = tpu.matmul %282, %0, %cst_67 {dimension_numbers = #tpu.dot_dimension_numbers<[1], [0], [0], [1], [0, 0, 1, 1], [], []>} : vector<2x48xf32>, vector<48x128xf32>, vector<2x128xf32> -> vector<2x128xf32>
    %284 = vector.broadcast %1 : vector<1x128xf32> to vector<2x128xf32>
    %285 = arith.addf %283, %284 : vector<2x128xf32>
    %286 = arith.negf %285 : vector<2x128xf32>
    %287 = math.exp %286 : vector<2x128xf32>
    %cst_68 = arith.constant 1.000000e+00 : f32
    %288 = vector.broadcast %cst_68 : f32 to vector<2x128xf32>
    %289 = arith.addf %288, %287 : vector<2x128xf32>
    %290 = arith.divf %288, %289 : vector<2x128xf32>
    %291 = math.tanh %285 : vector<2x128xf32>
    %292 = vector.extract_strided_slice %290 {offsets = [0, 0], sizes = [2, 32], strides = [1, 1]} : vector<2x128xf32> to vector<2x32xf32>
    %293 = vector.extract_strided_slice %290 {offsets = [0, 32], sizes = [2, 32], strides = [1, 1]} : vector<2x128xf32> to vector<2x32xf32>
    %294 = vector.extract_strided_slice %291 {offsets = [0, 64], sizes = [2, 32], strides = [1, 1]} : vector<2x128xf32> to vector<2x32xf32>
    %295 = vector.extract_strided_slice %290 {offsets = [0, 96], sizes = [2, 32], strides = [1, 1]} : vector<2x128xf32> to vector<2x32xf32>
    %296 = arith.mulf %293, %253 : vector<2x32xf32>
    %297 = arith.mulf %292, %294 : vector<2x32xf32>
    %298 = arith.addf %296, %297 : vector<2x32xf32>
    %299 = math.tanh %298 : vector<2x32xf32>
    %300 = arith.mulf %295, %299 : vector<2x32xf32>
    %301 = tpu.concatenate %300, %274 in 1 : vector<2x32xf32>, vector<2x32xf32> -> vector<2x64xf32>
    %cst_69 = arith.constant dense<0.000000e+00> : vector<2x128xf32>
    %302 = tpu.matmul %301, %2, %cst_69 {dimension_numbers = #tpu.dot_dimension_numbers<[1], [0], [0], [1], [0, 0, 1, 1], [], []>} : vector<2x64xf32>, vector<64x128xf32>, vector<2x128xf32> -> vector<2x128xf32>
    %303 = vector.broadcast %3 : vector<1x128xf32> to vector<2x128xf32>
    %304 = arith.addf %302, %303 : vector<2x128xf32>
    %305 = arith.negf %304 : vector<2x128xf32>
    %306 = math.exp %305 : vector<2x128xf32>
    %cst_70 = arith.constant 1.000000e+00 : f32
    %307 = vector.broadcast %cst_70 : f32 to vector<2x128xf32>
    %308 = arith.addf %307, %306 : vector<2x128xf32>
    %309 = arith.divf %307, %308 : vector<2x128xf32>
    %310 = math.tanh %304 : vector<2x128xf32>
    %311 = vector.extract_strided_slice %309 {offsets = [0, 0], sizes = [2, 32], strides = [1, 1]} : vector<2x128xf32> to vector<2x32xf32>
    %312 = vector.extract_strided_slice %309 {offsets = [0, 32], sizes = [2, 32], strides = [1, 1]} : vector<2x128xf32> to vector<2x32xf32>
    %313 = vector.extract_strided_slice %310 {offsets = [0, 64], sizes = [2, 32], strides = [1, 1]} : vector<2x128xf32> to vector<2x32xf32>
    %314 = vector.extract_strided_slice %309 {offsets = [0, 96], sizes = [2, 32], strides = [1, 1]} : vector<2x128xf32> to vector<2x32xf32>
    %315 = arith.mulf %312, %272 : vector<2x32xf32>
    %316 = arith.mulf %311, %313 : vector<2x32xf32>
    %317 = arith.addf %315, %316 : vector<2x32xf32>
    %318 = math.tanh %317 : vector<2x32xf32>
    %319 = arith.mulf %314, %318 : vector<2x32xf32>
    %c0_71 = arith.constant 0 : index
    %c7 = arith.constant 7 : index
    %320 = memref.load %arg1[%c0_71, %c7] : memref<2x8xi32, #tpu.memory_space<smem>>
    %321 = arith.index_cast %320 : i32 to index
    %c0_72 = arith.constant 0 : index
    %322 = vector.load %arg2[%321, %c0_72] : memref<32x16xf32, #tpu.memory_space<vmem>>, vector<1x16xf32>
    %c1_73 = arith.constant 1 : index
    %c7_74 = arith.constant 7 : index
    %323 = memref.load %arg1[%c1_73, %c7_74] : memref<2x8xi32, #tpu.memory_space<smem>>
    %324 = arith.index_cast %323 : i32 to index
    %c0_75 = arith.constant 0 : index
    %325 = vector.load %arg2[%324, %c0_75] : memref<32x16xf32, #tpu.memory_space<vmem>>, vector<1x16xf32>
    %326 = tpu.concatenate %322, %325 in 0 : vector<1x16xf32>, vector<1x16xf32> -> vector<2x16xf32>
    %327 = tpu.concatenate %326, %300 in 1 : vector<2x16xf32>, vector<2x32xf32> -> vector<2x48xf32>
    %cst_76 = arith.constant dense<0.000000e+00> : vector<2x128xf32>
    %328 = tpu.matmul %327, %0, %cst_76 {dimension_numbers = #tpu.dot_dimension_numbers<[1], [0], [0], [1], [0, 0, 1, 1], [], []>} : vector<2x48xf32>, vector<48x128xf32>, vector<2x128xf32> -> vector<2x128xf32>
    %329 = vector.broadcast %1 : vector<1x128xf32> to vector<2x128xf32>
    %330 = arith.addf %328, %329 : vector<2x128xf32>
    %331 = arith.negf %330 : vector<2x128xf32>
    %332 = math.exp %331 : vector<2x128xf32>
    %cst_77 = arith.constant 1.000000e+00 : f32
    %333 = vector.broadcast %cst_77 : f32 to vector<2x128xf32>
    %334 = arith.addf %333, %332 : vector<2x128xf32>
    %335 = arith.divf %333, %334 : vector<2x128xf32>
    %336 = math.tanh %330 : vector<2x128xf32>
    %337 = vector.extract_strided_slice %335 {offsets = [0, 0], sizes = [2, 32], strides = [1, 1]} : vector<2x128xf32> to vector<2x32xf32>
    %338 = vector.extract_strided_slice %335 {offsets = [0, 32], sizes = [2, 32], strides = [1, 1]} : vector<2x128xf32> to vector<2x32xf32>
    %339 = vector.extract_strided_slice %336 {offsets = [0, 64], sizes = [2, 32], strides = [1, 1]} : vector<2x128xf32> to vector<2x32xf32>
    %340 = vector.extract_strided_slice %335 {offsets = [0, 96], sizes = [2, 32], strides = [1, 1]} : vector<2x128xf32> to vector<2x32xf32>
    %341 = arith.mulf %338, %298 : vector<2x32xf32>
    %342 = arith.mulf %337, %339 : vector<2x32xf32>
    %343 = arith.addf %341, %342 : vector<2x32xf32>
    %344 = math.tanh %343 : vector<2x32xf32>
    %345 = arith.mulf %340, %344 : vector<2x32xf32>
    %346 = tpu.concatenate %345, %319 in 1 : vector<2x32xf32>, vector<2x32xf32> -> vector<2x64xf32>
    %cst_78 = arith.constant dense<0.000000e+00> : vector<2x128xf32>
    %347 = tpu.matmul %346, %2, %cst_78 {dimension_numbers = #tpu.dot_dimension_numbers<[1], [0], [0], [1], [0, 0, 1, 1], [], []>} : vector<2x64xf32>, vector<64x128xf32>, vector<2x128xf32> -> vector<2x128xf32>
    %348 = vector.broadcast %3 : vector<1x128xf32> to vector<2x128xf32>
    %349 = arith.addf %347, %348 : vector<2x128xf32>
    %350 = arith.negf %349 : vector<2x128xf32>
    %351 = math.exp %350 : vector<2x128xf32>
    %cst_79 = arith.constant 1.000000e+00 : f32
    %352 = vector.broadcast %cst_79 : f32 to vector<2x128xf32>
    %353 = arith.addf %352, %351 : vector<2x128xf32>
    %354 = arith.divf %352, %353 : vector<2x128xf32>
    %355 = math.tanh %349 : vector<2x128xf32>
    %356 = vector.extract_strided_slice %354 {offsets = [0, 0], sizes = [2, 32], strides = [1, 1]} : vector<2x128xf32> to vector<2x32xf32>
    %357 = vector.extract_strided_slice %354 {offsets = [0, 32], sizes = [2, 32], strides = [1, 1]} : vector<2x128xf32> to vector<2x32xf32>
    %358 = vector.extract_strided_slice %355 {offsets = [0, 64], sizes = [2, 32], strides = [1, 1]} : vector<2x128xf32> to vector<2x32xf32>
    %359 = vector.extract_strided_slice %354 {offsets = [0, 96], sizes = [2, 32], strides = [1, 1]} : vector<2x128xf32> to vector<2x32xf32>
    %360 = arith.mulf %357, %317 : vector<2x32xf32>
    %361 = arith.mulf %356, %358 : vector<2x32xf32>
    %362 = arith.addf %360, %361 : vector<2x32xf32>
    %363 = math.tanh %362 : vector<2x32xf32>
    %364 = arith.mulf %359, %363 : vector<2x32xf32>
    %365 = vector.extract_strided_slice %49 {offsets = [0, 0], sizes = [1, 32], strides = [1, 1]} : vector<2x32xf32> to vector<1x32xf32>
    %366 = vector.extract_strided_slice %94 {offsets = [0, 0], sizes = [1, 32], strides = [1, 1]} : vector<2x32xf32> to vector<1x32xf32>
    %367 = vector.extract_strided_slice %139 {offsets = [0, 0], sizes = [1, 32], strides = [1, 1]} : vector<2x32xf32> to vector<1x32xf32>
    %368 = vector.extract_strided_slice %184 {offsets = [0, 0], sizes = [1, 32], strides = [1, 1]} : vector<2x32xf32> to vector<1x32xf32>
    %369 = vector.extract_strided_slice %229 {offsets = [0, 0], sizes = [1, 32], strides = [1, 1]} : vector<2x32xf32> to vector<1x32xf32>
    %370 = vector.extract_strided_slice %274 {offsets = [0, 0], sizes = [1, 32], strides = [1, 1]} : vector<2x32xf32> to vector<1x32xf32>
    %371 = vector.extract_strided_slice %319 {offsets = [0, 0], sizes = [1, 32], strides = [1, 1]} : vector<2x32xf32> to vector<1x32xf32>
    %372 = vector.extract_strided_slice %364 {offsets = [0, 0], sizes = [1, 32], strides = [1, 1]} : vector<2x32xf32> to vector<1x32xf32>
    %373 = vector.extract_strided_slice %49 {offsets = [1, 0], sizes = [1, 32], strides = [1, 1]} : vector<2x32xf32> to vector<1x32xf32>
    %374 = vector.extract_strided_slice %94 {offsets = [1, 0], sizes = [1, 32], strides = [1, 1]} : vector<2x32xf32> to vector<1x32xf32>
    %375 = vector.extract_strided_slice %139 {offsets = [1, 0], sizes = [1, 32], strides = [1, 1]} : vector<2x32xf32> to vector<1x32xf32>
    %376 = vector.extract_strided_slice %184 {offsets = [1, 0], sizes = [1, 32], strides = [1, 1]} : vector<2x32xf32> to vector<1x32xf32>
    %377 = vector.extract_strided_slice %229 {offsets = [1, 0], sizes = [1, 32], strides = [1, 1]} : vector<2x32xf32> to vector<1x32xf32>
    %378 = vector.extract_strided_slice %274 {offsets = [1, 0], sizes = [1, 32], strides = [1, 1]} : vector<2x32xf32> to vector<1x32xf32>
    %379 = vector.extract_strided_slice %319 {offsets = [1, 0], sizes = [1, 32], strides = [1, 1]} : vector<2x32xf32> to vector<1x32xf32>
    %380 = vector.extract_strided_slice %364 {offsets = [1, 0], sizes = [1, 32], strides = [1, 1]} : vector<2x32xf32> to vector<1x32xf32>
    %381 = tpu.concatenate %365, %366, %367, %368, %369, %370, %371, %372, %373, %374, %375, %376, %377, %378, %379, %380 in 0 : vector<1x32xf32>, vector<1x32xf32>, vector<1x32xf32>, vector<1x32xf32>, vector<1x32xf32>, vector<1x32xf32>, vector<1x32xf32>, vector<1x32xf32>, vector<1x32xf32>, vector<1x32xf32>, vector<1x32xf32>, vector<1x32xf32>, vector<1x32xf32>, vector<1x32xf32>, vector<1x32xf32>, vector<1x32xf32> -> vector<16x32xf32>
    %c0_80 = arith.constant 0 : index
    %c0_81 = arith.constant 0 : index
    %382 = vector.load %arg7[%c0_80, %c0_81] : memref<32x32xf32, #tpu.memory_space<vmem>>, vector<32x32xf32>
    %cst_82 = arith.constant dense<0.000000e+00> : vector<16x32xf32>
    %383 = tpu.matmul %381, %382, %cst_82 {dimension_numbers = #tpu.dot_dimension_numbers<[1], [0], [0], [1], [0, 0, 1, 1], [], []>} : vector<16x32xf32>, vector<32x32xf32>, vector<16x32xf32> -> vector<16x32xf32>
    %c0_83 = arith.constant 0 : index
    %c0_84 = arith.constant 0 : index
    %384 = vector.load %arg8[%c0_83, %c0_84] : memref<1x32xf32, #tpu.memory_space<vmem>>, vector<1x32xf32>
    %385 = vector.broadcast %384 : vector<1x32xf32> to vector<16x32xf32>
    %386 = arith.addf %383, %385 : vector<16x32xf32>
    %c0_85 = arith.constant 0 : index
    %c0_86 = arith.constant 0 : index
    %387 = vector.load %arg9[%c0_85, %c0_86] : memref<16x32xf32, #tpu.memory_space<vmem>>, vector<16x32xf32>
    tpu.vector_store %arg9[%c0_85, %c0_86], %386 {strides = array<i32>} : memref<16x32xf32, #tpu.memory_space<vmem>>, vector<16x32xf32>,
    %c0_87 = arith.constant 0 : index
    %c0_88 = arith.constant 0 : index
    %c0_89 = arith.constant 0 : index
    %388 = vector.load %arg10[%c0_87, %c0_88, %c0_89] : memref<2x2x32xf32, #tpu.memory_space<vmem>>, vector<1x2x32xf32>
    %389 = vector.shape_cast %388 : vector<1x2x32xf32> to vector<2x32xf32>
    %390 = vector.shape_cast %345 : vector<2x32xf32> to vector<1x2x32xf32>
    tpu.vector_store %arg10[%c0_87, %c0_88, %c0_89], %390 {strides = array<i32>} : memref<2x2x32xf32, #tpu.memory_space<vmem>>, vector<1x2x32xf32>,
    %c1_90 = arith.constant 1 : index
    %c0_91 = arith.constant 0 : index
    %c0_92 = arith.constant 0 : index
    %391 = vector.load %arg10[%c1_90, %c0_91, %c0_92] : memref<2x2x32xf32, #tpu.memory_space<vmem>>, vector<1x2x32xf32>
    %392 = vector.shape_cast %391 : vector<1x2x32xf32> to vector<2x32xf32>
    %393 = vector.shape_cast %364 : vector<2x32xf32> to vector<1x2x32xf32>
    tpu.vector_store %arg10[%c1_90, %c0_91, %c0_92], %393 {strides = array<i32>} : memref<2x2x32xf32, #tpu.memory_space<vmem>>, vector<1x2x32xf32>,
    %c0_93 = arith.constant 0 : index
    %c0_94 = arith.constant 0 : index
    %c0_95 = arith.constant 0 : index
    %394 = vector.load %arg11[%c0_93, %c0_94, %c0_95] : memref<2x2x32xf32, #tpu.memory_space<vmem>>, vector<1x2x32xf32>
    %395 = vector.shape_cast %394 : vector<1x2x32xf32> to vector<2x32xf32>
    %396 = vector.shape_cast %343 : vector<2x32xf32> to vector<1x2x32xf32>
    tpu.vector_store %arg11[%c0_93, %c0_94, %c0_95], %396 {strides = array<i32>} : memref<2x2x32xf32, #tpu.memory_space<vmem>>, vector<1x2x32xf32>,
    %c1_96 = arith.constant 1 : index
    %c0_97 = arith.constant 0 : index
    %c0_98 = arith.constant 0 : index
    %397 = vector.load %arg11[%c1_96, %c0_97, %c0_98] : memref<2x2x32xf32, #tpu.memory_space<vmem>>, vector<1x2x32xf32>
    %398 = vector.shape_cast %397 : vector<1x2x32xf32> to vector<2x32xf32>
    %399 = vector.shape_cast %362 : vector<2x32xf32> to vector<1x2x32xf32>
    tpu.vector_store %arg11[%c1_96, %c0_97, %c0_98], %399 {strides = array<i32>} : memref<2x2x32xf32, #tpu.memory_space<vmem>>, vector<1x2x32xf32>,
    return
  }
  func.func @transform_0(%arg0: i32, %arg1: memref<2x8xi32, #tpu.memory_space<smem>>) -> (i32, i32) {
    %c0_i32 = arith.constant 0 : i32
    %c0_i32_0 = arith.constant 0 : i32
    %c0_i32_1 = arith.constant 0 : i32
    return %c0_i32, %c0_i32_0 : i32, i32
  }
  func.func @transform_1(%arg0: i32, %arg1: memref<2x8xi32, #tpu.memory_space<smem>>) -> (i32, i32) {
    %c0_i32 = arith.constant 0 : i32
    %c0_i32_0 = arith.constant 0 : i32
    %c0_i32_1 = arith.constant 0 : i32
    return %c0_i32, %c0_i32_0 : i32, i32
  }
  func.func @transform_2(%arg0: i32, %arg1: memref<2x8xi32, #tpu.memory_space<smem>>) -> (i32, i32) {
    %c0_i32 = arith.constant 0 : i32
    %c0_i32_0 = arith.constant 0 : i32
    %c0_i32_1 = arith.constant 0 : i32
    return %c0_i32, %c0_i32_0 : i32, i32
  }
  func.func @transform_3(%arg0: i32, %arg1: memref<2x8xi32, #tpu.memory_space<smem>>) -> (i32, i32) {
    %c0_i32 = arith.constant 0 : i32
    %c0_i32_0 = arith.constant 0 : i32
    %c0_i32_1 = arith.constant 0 : i32
    return %c0_i32, %c0_i32_0 : i32, i32
  }
  func.func @transform_4(%arg0: i32, %arg1: memref<2x8xi32, #tpu.memory_space<smem>>) -> (i32, i32) {
    %c0_i32 = arith.constant 0 : i32
    %c0_i32_0 = arith.constant 0 : i32
    %c0_i32_1 = arith.constant 0 : i32
    return %c0_i32, %c0_i32_0 : i32, i32
  }
  func.func @transform_5(%arg0: i32, %arg1: memref<2x8xi32, #tpu.memory_space<smem>>) -> (i32, i32) {
    %c0_i32 = arith.constant 0 : i32
    %c0_i32_0 = arith.constant 0 : i32
    %c0_i32_1 = arith.constant 0 : i32
    return %c0_i32, %c0_i32_0 : i32, i32
  }
  func.func @transform_6(%arg0: i32, %arg1: memref<2x8xi32, #tpu.memory_space<smem>>) -> (i32, i32) {
    %c0_i32 = arith.constant 0 : i32
    %c0_i32_0 = arith.constant 0 : i32
    %c0_i32_1 = arith.constant 0 : i32
    return %c0_i32, %c0_i32_0 : i32, i32
  }
  func.func @transform_7(%arg0: i32, %arg1: memref<2x8xi32, #tpu.memory_space<smem>>) -> (i32, i32) {
    %c0_i32 = arith.constant 0 : i32
    %c0_i32_0 = arith.constant 0 : i32
    %c0_i32_1 = arith.constant 0 : i32
    return %c0_i32, %c0_i32_0 : i32, i32
  }
  func.func @transform_8(%arg0: i32, %arg1: memref<2x8xi32, #tpu.memory_space<smem>>) -> (i32, i32, i32) {
    %c0_i32 = arith.constant 0 : i32
    %c0_i32_0 = arith.constant 0 : i32
    %c0_i32_1 = arith.constant 0 : i32
    %c0_i32_2 = arith.constant 0 : i32
    return %c0_i32, %c0_i32_0, %c0_i32_1 : i32, i32, i32
  }
  func.func @transform_9(%arg0: i32, %arg1: memref<2x8xi32, #tpu.memory_space<smem>>) -> (i32, i32, i32) {
    %c0_i32 = arith.constant 0 : i32
    %c0_i32_0 = arith.constant 0 : i32
    %c0_i32_1 = arith.constant 0 : i32
    %c0_i32_2 = arith.constant 0 : i32
    return %c0_i32, %c0_i32_0, %c0_i32_1 : i32, i32, i32
  }
}

</mosaic_0001>

<bundles_post_ra>
// kernel: tpu_custom_call.1
= control target key start
LH: loop header
LB: loop body
LE: loop exit
PB: predicated region body
PF: predicated region fallthrough
CT: control target
= control target key end

     0   :  { %s3598_s0 = inlined_call_operand.vmem [shape: s32[2,8], index: 0, kind: input, shape index: {}]   ;;  %s3599_s1 = inlined_call_operand.vmem [shape: f32[32,16], index: 1, kind: input, shape index: {}]   ;;  %s3600_s2 = inlined_call_operand.vmem [shape: f32[48,128], index: 2, kind: input, shape index: {}]   ;;  %s3601_s3 = inlined_call_operand.vmem [shape: f32[1,128], index: 3, kind: input, shape index: {}]   ;;  %s3602_s4 = inlined_call_operand.hbm [shape: f32[64,128], index: 4, kind: input, shape index: {}]   ;;  %s3603_s5 = inlined_call_operand.vmem [shape: f32[1,128], index: 5, kind: input, shape index: {}]   ;;  %s3604_s6 = inlined_call_operand.hbm [shape: f32[32,32], index: 6, kind: input, shape index: {}]   ;;  %s3605_s7 = inlined_call_operand.vmem [shape: f32[1,32], index: 7, kind: input, shape index: {}]   ;;  %s3606_s8 = inlined_call_operand.hbm [shape: f32[16,32], index: 8, kind: output, shape index: {0}]   ;;  %s3607_s9 = inlined_call_operand.hbm [shape: f32[2,2,32], index: 9, kind: output, shape index: {1}]   ;;  %s3608_s10 = inlined_call_operand.hbm [shape: f32[2,2,32], index: 10, kind: output, shape index: {2}]  }
   0x1   :  { %s16_s15 = sshll.u32 %s3598_s0, 4  ;;  %s17_s15 = int_to_ptr.vmem [resolvable:$true] %s16_s15 }
   0x2   :  { %s2849_s16 = scalar_lea.vmem %s17_s15, 32  ;;  %p2854_p1 = scmp.lt.s32.totalorder %s17_s15, %s17_s15 }
   0x3   :  { %p2850_p0 = scmp.ne.s32.totalorder %s17_s15, %s2849_s16  ;;  %p2855_p2 = scmp.lt.s32.totalorder %s2849_s16, %s2849_s16 }
   0x5   :  { %p2856_p3 = por %p2855_p2, %p2854_p1 }
   0x7   :  { %p2857_p4 = pnand %p2856_p3, %p2850_p0 }
   0x9   :  { %2860 = shalt.err (!%p2857_p4)  }
   0xa   :  { %s2981_s17 = smov [#allocation3]  }
   0xb   :  { %19 = dma.vmem_to_smem %s17_s15, 32, %s2981_s17, [#allocation2] }
   0xc   :  { %2971 = dma.done.wait [#allocation2], 32 }
   0xd   :  { %2972 = vsyncadd [#allocation2], 4294967264 }
   0xe   :  { %21 = sfence }
   0xf   :  { %22 = vsyncpa [#allocation5], 0 }
  0x10   :  { %23 = vsyncpa [#allocation8], 0 }
  0x11   :  { %24 = vsyncpa [#allocation6], 0 }
  0x12   :  { %25 = vsyncpa [#allocation11], 0  ;;  %s2982_s18 = smov [#allocation4]   ;;  %s2861_s21 = scalar_lea.hbm %s3602_s4, 1024 }
  0x13   :  { %s37_s19 = sshll.u32 %s2982_s18, 4  ;;  %p2862_p5 = scmp.ne.s32.totalorder %s3602_s4, %s2861_s21  ;;  %s38_s19 = int_to_ptr.vmem [resolvable:$true] %s37_s19 }
  0x14   :  { %p2865_p6 = scmp.lt.u32.totalorder %s2861_s21, %s3602_s4 }
  0x16   :  { %p2867_p7 = pnand %p2865_p6, %p2862_p5 }
  0x18   :  { %2870 = shalt.err (!%p2867_p7)
}
  0x19   :  { %s2871_s26 = scalar_lea.vmem %s38_s19, 1024  ;;  %p2876_p9 = scmp.lt.s32.totalorder %s38_s19, %s38_s19 }
  0x1a   :  { %p2872_p8 = scmp.ne.s32.totalorder %s38_s19, %s2871_s26  ;;  %p2877_p10 = scmp.lt.s32.totalorder %s2871_s26, %s2871_s26 }
  0x1c   :  { %p2878_p11 = por %p2877_p10, %p2876_p9 }
  0x1e   :  { %p2879_p12 = pnand %p2878_p11, %p2872_p8 }
  0x20   :  { %2882 = shalt.err (!%p2879_p12)
}
  0x21   :  { %s2983_s27 = smov 128   ;;  %s2984_s28 = smov 8  }
  0x22   :  { %43 = dma.hbm_to_vmem [thread:$0]  %s3602_s4, 1024, %s38_s19, [#allocation5], %s2983_s27, %s2983_s27, %s2984_s28  }
  0x23   :  { %s2985_s11 = smov [#allocation7]   ;;  %s2883_s15 = scalar_lea.hbm %s3604_s6, 512 }
  0x24   :  { %s51_s12 = sshll.u32 %s2985_s11, 4  ;;  %p2884_p13 = scmp.ne.s32.totalorder %s3604_s6, %s2883_s15  ;;  %s52_s12 = int_to_ptr.vmem [resolvable:$true] %s51_s12 }
  0x25   :  { %p2887_p0 = scmp.lt.u32.totalorder %s2883_s15, %s3604_s6 }
  0x27   :  { %p2889_p1 = pnand %p2887_p0, %p2884_p13 }
  0x29   :  { %2892 = shalt.err (!%p2889_p1)
}
  0x2a   :  { %s2893_s20 = scalar_lea.vmem %s52_s12, 512  ;;  %p2898_p3 = scmp.lt.s32.totalorder %s52_s12, %s52_s12 }
  0x2b   :  { %p2894_p2 = scmp.ne.s32.totalorder %s52_s12, %s2893_s20  ;;  %p2899_p4 = scmp.lt.s32.totalorder %s2893_s20, %s2893_s20 }
  0x2d   :  { %p2900_p5 = por %p2899_p4, %p2898_p3 }
  0x2f   :  { %p2901_p6 = pnand %p2900_p5, %p2894_p2 }
  0x31   :  { %2904 = shalt.err (!%p2901_p6)
}
  0x32   :  { %57 = dma.hbm_to_vmem [thread:$0]  %s3604_s6, 512, %s52_s12, [#allocation8], %s2983_s27, %s2983_s27, %s2984_s28  }
  0x33   :  { %2973 = dma.done.wait [#allocation5], 1024  }
  0x34   :  { %2974 = vsyncadd [#allocation5], 4294966272 }
  0x35   :  { %2975 = dma.done.wait [#allocation8], 512  }
  0x36   :  { %2976 = vsyncadd [#allocation8], 4294966784  ;;  %v2986_v0 = vmov 0.0|0.0   ;;  %vm2987_vm0 = vmmov 0   ;;  %v2988_v1 = vmov 0.0   ;;  %s82_s21 = sld [smem:[#allocation3]] }
  0x37   :  { %2527 = vmatprep.subr.bf16.mxu0 %v2986_v0  ;;  %2256 = vmatprep.mubr.msk.f32.mxu0 %vm2987_vm0, %v2988_v1  ;;  %s2058_s22 = sld [smem:[#allocation3 + $0x80]]  ;;  %v66_v2 = vld [vmem:[%s3600_s2] sm:$0xff]  ;;  %v67_v3 = vld [vmem:[%s3600_s2 + $0x8] sm:$0xff]  ;;  %v68_v4 = vld [vmem:[%s3600_s2 + $0x10] sm:$0xff]  ;;  %vm91_vm1 = vcmask 1040384   ;;  %vm93_vm2 = vcmask 130048  }
  0x38   :  { %2536 = vmatprep.subr.bf16.mxu1 %v2986_v0  ;;  %2275 = vmatprep.mubr.msk.f32.mxu1 %vm2987_vm0, %v2988_v1  ;;  %v3103_v5 = vpack.c.bf16 %v67_v3, %v66_v2  ;;  %v69_v6 = vld [vmem:[%s3600_s2 + $0x18] sm:$0xff]  ;;  %v70_v9 = vld [vmem:[%s3600_s2 + $0x20] sm:$0xff]  ;;  %v71_v10 = vld [vmem:[%s3600_s2 + $0x28] sm:$0xff]  ;;  %vm101_vm3 = vcmask 392192   ;;  %s2991_s6 = smov 48   ;;  %s2066_s23 = sld [smem:[#allocation3 + $0x81]] }
  0x39   :  { %v3112_v8 = vpack.c.bf16 %v69_v6, %v68_v4  ;;  %v3122_v13 = vpack.c.bf16 %v71_v10, %v70_v9  ;;  %v3141_v16 = vld [vmem:[%s3601_s3] ss:$0 sm:$0xff]  ;;  %v74_v31 = vld [vmem:[#allocation4 + $0x8] sm:$0xff]  ;;  %v75_v32 = vld [vmem:[#allocation4 + $0x10] sm:$0xff]  ;;  %s2065_s24 = sld [smem:[#allocation3 + $0x1]]  ;;  %vm203_vm4 = vcmask 261120  }
  0x3a   :  { %2529 = vmatpush3.bf16.msra.mxu0 %v3103_v5  ;;  %v73_v30 = vld [vmem:[#allocation4] sm:$0xff]  ;;  %v76_v34 = vld [vmem:[#allocation4 + $0x18] sm:$0xff]  ;;  %v78_v37 = vld [vmem:[#allocation4 + $0x28] sm:$0xff]  ;;  %vm211_vm5 = vcmask 523264   ;;  %s2072_s15 = sld [smem:[#allocation3 + $0x82]]  ;;  %s2078_s19 = sld [smem:[#allocation3 + $0x83]] }
  0x3b   :  { %2530 = vmatprep.subr.bf16.mxu0 %v2986_v0  ;;  %v3149_v33 = vpack.c.bf16 %v74_v31, %v73_v30  ;;  %v3152_v35 = vpack.c.bf16 %v76_v34, %v75_v32  ;;  %v77_v36 = vld [vmem:[#allocation4 + $0x20] sm:$0xff]  ;;  %v79_v39 = vld [vmem:[#allocation4 + $0x30] sm:$0xff]  ;;  %v80_v40 = vld [vmem:[#allocation4 + $0x38] sm:$0xff]  ;;  %s2071_s16 = sld [smem:[#allocation3 + $0x2]]  ;;  %vm1858_vm6 = vcmask 1041408   ;;  %s2083_s13 = sld [smem:[#allocation3 + $0x4]] }
  0x3c   :  { %s83_s17 = scalar_lea.vmem %s3599_s1, %s82_s21  ;;  %s2989_s21 = smov 64   ;;  %v3156_v38 = vpack.c.bf16 %v78_v37, %v77_v36  ;;  %v3161_v42 = vpack.c.bf16 %v80_v40, %v79_v39  ;;  %v3200_v53 = vld [vmem:[%s3603_s5] ss:$0 sm:$0xff]  ;;  %vm1860_vm7 = vcmask 1042432   ;;  %vm1862_vm8 = vcmask 1043456  }
  0x3d   :  { %s86_s12 = scalar_lea.vmem %s3599_s1, %s2058_s22  ;;  %v84_v12 = vld [vmem:[%s83_s17] sm:$0x1]  ;;  %s2990_s22 = smov 32   ;;  %2538 = vmatpush3.bf16.msra.mxu1 %v3149_v33  ;;  %vm1864_vm9 = vcmask 1044480   ;;  %vm1866_vm10 = vcmask 1045504   ;;  %vm1975_vm11 = vcmask 254976  }
  0x3e   :  { %v87_v7 = vld [vmem:[%s86_s12] sm:$0x1]  ;;  %2532 = vmatpush3.bf16.msra.mxu0 %v3112_v8  ;;  %2539 = vmatprep.subr.bf16.mxu1 %v2986_v0  ;;  %s313_s29 = scalar_lea.vmem %s3599_s1, %s2066_s23  ;;  %s2077_s23 = sld [smem:[#allocation3 + $0x3]]  ;;  %vm1868_vm12 = vcmask 1046528  }
  0x3f   :  { %v89_v11 = vrot.slane %v87_v7, 7  ;;  %2533 = vmatprep.subr.bf16.mxu0 %v2986_v0  ;;  %v314_v45 = vld [vmem:[%s313_s29] sm:$0x1]  ;;  %s310_s12 = scalar_lea.vmem %s3599_s1, %s2065_s24  ;;  %s2090_s20 = sld [smem:[#allocation3 + $0x85]] }
  0x40   :  { %v316_v46 = vrot.slane %v314_v45, 7  ;;  %v311_v47 = vld [vmem:[%s310_s12] sm:$0x1]  ;;  %s530_s0 = scalar_lea.vmem %s3599_s1, %s2072_s15  ;;  %s747_s26 = scalar_lea.vmem %s3599_s1, %s2078_s19 }
  0x41   :  { %v92_v14 = vsel %vm91_vm1, %v84_v12, %v89_v11  ;;  %2541 = vmatpush3.bf16.msra.mxu1 %v3152_v35  ;;  %s527_s2 = scalar_lea.vmem %s3599_s1, %s2071_s16  ;;  %s2084_s12 = sld [smem:[#allocation3 + $0x84]] }
  0x42   :  { %2535 = vmatpush3.bf16.msra.mxu0 %v3122_v13  ;;  %v94_v15 = vsel %vm93_vm2, %v92_v14, 0.0  ;;  %2542 = vmatprep.subr.bf16.mxu1 %v2986_v0  ;;  %v318_v48 = vsel %vm91_vm1, %v311_v47, %v316_v46  ;;  %v528_v31 = vld [vmem:[%s527_s2] sm:$0x1]  ;;  %s2089_s4 = sld [smem:[#allocation3 + $0x5]]  ;;  %s2096_s29 = sld [smem:[#allocation3 + $0x86]] }
  0x43   :  { %2548 = vmatprep.subr.bf16.mxu0 %v2986_v0  ;;  %s2095_s30 = sld [smem:[#allocation3 + $0x6]]  ;;  %s2102_s17 = sld [smem:[#allocation3 + $0x87]] }
  0x44   :  { %s744_s11 = scalar_lea.vmem %s3599_s1, %s2077_s23  ;;  %s2101_s18 = sld [smem:[#allocation3 + $0x7]] }
  0x45   :  { %2257 = vmatmul.mubr.msk.f32.vlgmr.msra.gmra.mrb[0].mxu0 %vm101_vm3, %v94_v15  ;;  %2544 = vmatpush3.bf16.msra.mxu1 %v3156_v38  ;;  %s1181_s23 = scalar_lea.vmem %s3599_s1, %s2090_s20 }
  0x46   :  { %2550 = vmatpush3.bf16.msra.mxu0 %v3103_v5  ;;  %2290 = vmatprep.mubr.msk.f32.mxu0 %vm2987_vm0, %v2988_v1 }
  0x47   :  { %2551 = vmatprep.subr.bf16.mxu0 %v2986_v0  ;;  %2545 = vmatprep.subr.bf16.mxu1 %v2986_v0  ;;  %s964_s16 = scalar_lea.vmem %s3599_s1, %s2084_s12 }
  0x49   :  { %2547 = vmatpush3.bf16.msra.mxu1 %v3161_v42 }
  0x4a   :  { %2553 = vmatpush3.bf16.msra.mxu0 %v3112_v8  ;;  %2557 = vmatprep.subr.bf16.mxu1 %v2986_v0 }
  0x4b   :  { %2554 = vmatprep.subr.bf16.mxu0 %v2986_v0 }
  0x4e   :  { %2556 = vmatpush3.bf16.msra.mxu0 %v3122_v13 }
  0x4f   :  { %2569 = vmatprep.subr.bf16.mxu0 %v2986_v0 }
 0x118   :  { %v171_v17 = vpop.f32.mrb[0].mxu0 }
 0x119   :  { %v172_v18 = vadd.f32 %v3141_v16, %v171_v17  ;;  %v2258_v19 = vpop.f32.mrb[1].mxu0 }
 0x11b   :  { %2719 = vtanh.f32 %v172_v18  ;;  %v2061_v21 = vmul.f32 -1.442695, %v172_v18 }
 0x11d   :  { %2721 = vpow2.f32 %v2061_v21 }
 0x125   :  { %v2720_v20 = vpop.eup %2719 }
 0x126   :  { %184 = vrot.lane.b32.xlu0 %v2720_v20, %s2989_s21 }
 0x127   :  { %v2722_v22 = vpop.eup %2721 }
 0x128   :  { %v178_v23 = vadd.f32 1.0, %v2722_v22 }
 0x12a   :  { %2723 = vrcp.f32 %v178_v23 }
 0x134   :  { %v2724_v24 = vpop.eup %2723 }
 0x135   :  { %v182_v27 = vmul.f32 0.0, %v2724_v24 }
 0x198   :  { %v185_v25 = vpop.permute.xlu0 %184 }
 0x199   :  { %v187_v26 = vmul.f32 %v2724_v24, %v185_v25 }
 0x19b   :  { %189 = vrot.lane.b32.xlu0 %v187_v26, %s2990_s22 }
 0x20d   :  { %v190_v28 = vpop.permute.xlu0 %189 }
 0x20e   :  { %v3146_v29 = vadd.f32 %v190_v28, %v182_v27  ;;  %v531_v28 = vld [vmem:[%s530_s0] sm:$0x1]  ;;  %s961_s0 = scalar_lea.vmem %s3599_s1, %s2083_s13  ;;  %s1398_s13 = scalar_lea.vmem %s3599_s1, %s2096_s29 }
 0x210   :  { %2725 = vtanh.f32 %v3146_v29 }
 0x21a   :  { %v2726_v41 = vpop.eup %2725 }
 0x21b   :  { %195 = vrot.lane.b32.xlu1 %v2726_v41, %s2989_s21 }
 0x28d   :  { %v196_v43 = vpop.permute.xlu1 %195 }
 0x28e   :  { %v198_v44 = vmul.f32 %v2724_v24, %v196_v43 }
 0x290   :  { %319 = vrot.lane.b32.xlu0 %v198_v44, %s2991_s6  ;;  %200 = vrot.lane.b32.xlu1 %v198_v44, %s2990_s22 }
 0x302   :  { %v320_v49 = vpop.permute.xlu0 %319  ;;  %v201_v50 = vpop.permute.xlu1 %200 }
 0x303   :  { %v322_v51 = vsel %vm93_vm2, %v318_v48, %v320_v49  ;;  %v204_v52 = vsel %vm203_vm4, %v201_v50, 0.0 }
 0x304   :  { %2276 = vmatmul.mubr.msk.f32.vlgmr.msra.gmra.mrb[0].mxu1 %vm211_vm5, %v204_v52  ;;  %2291 = vmatmul.mubr.msk.f32.vlgmr.msra.gmra.mrb[2].mxu0 %vm101_vm3, %v322_v51 }
 0x305   :  { %2559 = vmatpush3.bf16.msra.mxu1 %v3149_v33  ;;  %2571 = vmatpush3.bf16.msra.mxu0 %v3103_v5 }
 0x306   :  { %2560 = vmatprep.subr.bf16.mxu1 %v2986_v0  ;;  %2572 = vmatprep.subr.bf16.mxu0 %v2986_v0 }
 0x307   :  { %2309 = vmatprep.mubr.msk.f32.mxu1 %vm2987_vm0, %v2988_v1  ;;  %2324 = vmatprep.mubr.msk.f32.mxu0 %vm2987_vm0, %v2988_v1 }
 0x309   :  { %2562 = vmatpush3.bf16.msra.mxu1 %v3152_v35  ;;  %2574 = vmatpush3.bf16.msra.mxu0 %v3112_v8 }
 0x30a   :  { %2563 = vmatprep.subr.bf16.mxu1 %v2986_v0  ;;  %2575 = vmatprep.subr.bf16.mxu0 %v2986_v0 }
 0x30d   :  { %2565 = vmatpush3.bf16.msra.mxu1 %v3156_v38  ;;  %2577 = vmatpush3.bf16.msra.mxu0 %v3122_v13 }
 0x30e   :  { %2566 = vmatprep.subr.bf16.mxu1 %v2986_v0  ;;  %2590 = vmatprep.subr.bf16.mxu0 %v2986_v0 }
 0x311   :  { %2568 = vmatpush3.bf16.msra.mxu1 %v3161_v42 }
 0x312   :  { %2578 = vmatprep.subr.bf16.mxu1 %v2986_v0 }
 0x3d7   :  { %v281_v54 = vpop.f32.mrb[0].mxu1  ;;  %v392_v55 = vpop.f32.mrb[2].mxu0 }
 0x3d8   :  { %v282_v56 = vadd.f32 %v3200_v53, %v281_v54  ;;  %v393_v57 = vadd.f32 %v3141_v16, %v392_v55  ;;  %v2277_v58 = vpop.f32.mrb[1].mxu1  ;;  %v2292_v59 = vpop.f32.mrb[3].mxu0 }
 0x3da   :  { %2727 = vtanh.f32 %v282_v56  ;;  %v2064_v62 = vmul.f32 -1.442695, %v282_v56  ;;  %v2068_v63 = vmul.f32 -1.442695, %v393_v57 }
 0x3db   :  { %2729 = vtanh.f32 %v393_v57 }
 0x3dc   :  { %2731 = vpow2.f32 %v2064_v62 }
 0x3dd   :  { %2733 = vpow2.f32 %v2068_v63 }
 0x3e4   :  { %v2728_v60 = vpop.eup %2727 }
 0x3e5   :  { %v2730_v61 = vpop.eup %2729  ;;  %294 = vrot.lane.b32.xlu1 %v2728_v60, %s2989_s21 }
 0x3e6   :  { %405 = vrot.lane.b32.xlu0 %v2730_v61, %s2989_s21  ;;  %v2732_v2 = vpop.eup %2731 }
 0x3e7   :  { %v2734_v3 = vpop.eup %2733  ;;  %v288_v4 = vadd.f32 1.0, %v2732_v2 }
 0x3e8   :  { %v399_v6 = vadd.f32 1.0, %v2734_v3 }
 0x3e9   :  { %2735 = vrcp.f32 %v288_v4 }
 0x3ea   :  { %2737 = vrcp.f32 %v399_v6 }
 0x3f3   :  { %v2736_v7 = vpop.eup %2735 }
 0x3f4   :  { %v2738_v10 = vpop.eup %2737  ;;  %v292_v15 = vmul.f32 0.0, %v2736_v7 }
 0x3f5   :  { %v403_v18 = vmul.f32 %v2738_v10, %v3146_v29  ;;  %v533_v29 = vrot.slane %v531_v28, 7 }
 0x3f7   :  { %v535_v36 = vsel %vm91_vm1, %v528_v31, %v533_v29 }
 0x457   :  { %v295_v9 = vpop.permute.xlu1 %294 }
 0x458   :  { %v297_v11 = vmul.f32 %v2736_v7, %v295_v9  ;;  %v406_v12 = vpop.permute.xlu0 %405 }
 0x459   :  { %v408_v14 = vmul.f32 %v2738_v10, %v406_v12 }
 0x45a   :  { %299 = vrot.lane.b32.xlu1 %v297_v11, %s2990_s22 }
 0x45b   :  { %410 = vrot.lane.b32.xlu0 %v408_v14, %s2990_s22 }
 0x4cc   :  { %v300_v17 = vpop.permute.xlu1 %299 }
 0x4cd   :  { %v3209_v19 = vadd.f32 %v300_v17, %v292_v15  ;;  %v411_v20 = vpop.permute.xlu0 %410  ;;  %v748_v15 = vld [vmem:[%s747_s26] sm:$0x1]  ;;  %s1178_s26 = scalar_lea.vmem %s3599_s1, %s2089_s4  ;;  %s1615_s4 = scalar_lea.vmem %s3599_s1, %s2102_s17 }
 0x4ce   :  { %v3211_v21 = vadd.f32 %v411_v20, %v403_v18  ;;  %v750_v17 = vrot.slane %v748_v15, 7  ;;  %v745_v18 = vld [vmem:[%s744_s11] sm:$0x1] }
 0x4cf   :  { %2739 = vtanh.f32 %v3209_v19 }
 0x4d0   :  { %2741 = vtanh.f32 %v3211_v21 }
 0x4d9   :  { %v2740_v22 = vpop.eup %2739 }
 0x4da   :  { %v2742_v23 = vpop.eup %2741  ;;  %305 = vrot.lane.b32.xlu1 %v2740_v22, %s2989_s21  ;;  %v752_v22 = vsel %vm91_vm1, %v745_v18, %v750_v17 }
 0x4db   :  { %416 = vrot.lane.b32.xlu0 %v2742_v23, %s2989_s21 }
 0x54c   :  { %v306_v24 = vpop.permute.xlu1 %305 }
 0x54d   :  { %v3217_v25 = vmul.f32 %v2736_v7, %v306_v24  ;;  %v417_v26 = vpop.permute.xlu0 %416 }
 0x54e   :  { %v419_v27 = vmul.f32 %v2738_v10, %v417_v26 }
 0x54f   :  { %425 = vrot.lane.b32.xlu0 %v3217_v25, %s2989_s21 }
 0x550   :  { %421 = vrot.lane.b32.xlu1 %v419_v27, %s2990_s22 }
 0x554   :  { %536 = vrot.lane.b32.xlu1 %v419_v27, %s2991_s6 }
 0x5c1   :  { %v426_v30 = vpop.permute.xlu0 %425 }
 0x5c2   :  { %v422_v32 = vpop.permute.xlu1 %421 }
 0x5c3   :  { %v428_v34 = vsel %vm203_vm4, %v422_v32, %v426_v30 }
 0x5c4   :  { %2310 = vmatmul.mubr.msk.f32.vlgmr.msra.gmra.mrb[2].mxu1 %vm211_vm5, %v428_v34 }
 0x5c5   :  { %2580 = vmatpush3.bf16.msra.mxu1 %v3149_v33  ;;  %2343 = vmatprep.mubr.msk.f32.mxu1 %vm2987_vm0, %v2988_v1 }
 0x5c6   :  { %v537_v37 = vpop.permute.xlu1 %536  ;;  %2581 = vmatprep.subr.bf16.mxu1 %v2986_v0 }
 0x5c7   :  { %v539_v39 = vsel %vm93_vm2, %v535_v36, %v537_v37 }
 0x5c8   :  { %2325 = vmatmul.mubr.msk.f32.vlgmr.msra.gmra.mrb[4].mxu0 %vm101_vm3, %v539_v39 }
 0x5c9   :  { %2583 = vmatpush3.bf16.msra.mxu1 %v3152_v35  ;;  %2592 = vmatpush3.bf16.msra.mxu0 %v3103_v5 }
 0x5ca   :  { %2584 = vmatprep.subr.bf16.mxu1 %v2986_v0  ;;  %2593 = vmatprep.subr.bf16.mxu0 %v2986_v0 }
 0x5cb   :  { %2358 = vmatprep.mubr.msk.f32.mxu0 %vm2987_vm0, %v2988_v1 }
 0x5cd   :  { %2586 = vmatpush3.bf16.msra.mxu1 %v3156_v38  ;;  %2595 = vmatpush3.bf16.msra.mxu0 %v3112_v8 }
 0x5ce   :  { %2587 = vmatprep.subr.bf16.mxu1 %v2986_v0  ;;  %2596 = vmatprep.subr.bf16.mxu0 %v2986_v0 }
 0x5d1   :  { %2589 = vmatpush3.bf16.msra.mxu1 %v3161_v42  ;;  %2598 = vmatpush3.bf16.msra.mxu0 %v3122_v13 }
 0x5d2   :  { %2599 = vmatprep.subr.bf16.mxu0 %v2986_v0  ;;  %2611 = vmatprep.subr.bf16.mxu1 %v2986_v0 }
 0x697   :  { %v498_v40 = vpop.f32.mrb[2].mxu1 }
 0x698   :  { %v499_v41 = vadd.f32 %v3200_v53, %v498_v40  ;;  %v2311_v43 = vpop.f32.mrb[3].mxu1 }
 0x69a   :  { %2743 = vtanh.f32 %v499_v41  ;;  %v2070_v49 = vmul.f32 -1.442695, %v499_v41 }
 0x69b   :  { %v609_v44 = vpop.f32.mrb[4].mxu0 }
 0x69c   :  { %v610_v45 = vadd.f32 %v3141_v16, %v609_v44  ;;  %v2326_v46 = vpop.f32.mrb[5].mxu0 }
 0x69e   :  { %2745 = vtanh.f32 %v610_v45  ;;  %v2074_v50 = vmul.f32 -1.442695, %v610_v45 }
 0x69f   :  { %2747 = vpow2.f32 %v2070_v49 }
 0x6a0   :  { %2749 = vpow2.f32 %v2074_v50 }
 0x6a4   :  { %v2744_v47 = vpop.eup %2743 }
 0x6a5   :  { %511 = vrot.lane.b32.xlu0 %v2744_v47, %s2989_s21 }
 0x6a8   :  { %v2746_v48 = vpop.eup %2745 }
 0x6a9   :  { %622 = vrot.lane.b32.xlu1 %v2746_v48, %s2989_s21  ;;  %v2748_v51 = vpop.eup %2747 }
 0x6aa   :  { %v505_v52 = vadd.f32 1.0, %v2748_v51  ;;  %v2750_v54 = vpop.eup %2749 }
 0x6ab   :  { %v616_v55 = vadd.f32 1.0, %v2750_v54 }
 0x6ac   :  { %2751 = vrcp.f32 %v505_v52 }
 0x6ad   :  { %2753 = vrcp.f32 %v616_v55 }
 0x6b6   :  { %v2752_v56 = vpop.eup %2751 }
 0x6b7   :  { %v2754_v59 = vpop.eup %2753  ;;  %v509_v62 = vmul.f32 %v2752_v56, %v3209_v19 }
 0x6b8   :  { %v620_v3 = vmul.f32 %v2754_v59, %v3211_v21 }
 0x717   :  { %v512_v57 = vpop.permute.xlu0 %511 }
 0x718   :  { %v514_v58 = vmul.f32 %v2752_v56, %v512_v57 }
 0x71a   :  { %516 = vrot.lane.b32.xlu0 %v514_v58, %s2990_s22 }
 0x71b   :  { %v623_v60 = vpop.permute.xlu1 %622 }
 0x71c   :  { %v625_v61 = vmul.f32 %v2754_v59, %v623_v60 }
 0x71e   :  { %627 = vrot.lane.b32.xlu1 %v625_v61, %s2990_s22 }
 0x78c   :  { %v517_v63 = vpop.permute.xlu0 %516 }
 0x78d   :  { %v3259_v2 = vadd.f32 %v517_v63, %v509_v62  ;;  %v1843_v62 = vrot.slane %v3217_v25, 1 }
 0x78f   :  { %2755 = vtanh.f32 %v3259_v2 }
 0x790   :  { %v628_v4 = vpop.permute.xlu1 %627 }
 0x791   :  { %v3263_v6 = vadd.f32 %v628_v4, %v620_v3 }
 0x793   :  { %2757 = vtanh.f32 %v3263_v6 }
 0x799   :  { %v2756_v7 = vpop.eup %2755 }
 0x79a   :  { %522 = vrot.lane.b32.xlu0 %v2756_v7, %s2989_s21 }
 0x79d   :  { %v2758_v9 = vpop.eup %2757 }
 0x79e   :  { %633 = vrot.lane.b32.xlu1 %v2758_v9, %s2989_s21 }
 0x80c   :  { %v523_v10 = vpop.permute.xlu0 %522 }
 0x80d   :  { %v3268_v11 = vmul.f32 %v2752_v56, %v523_v10 }
 0x80f   :  { %642 = vrot.lane.b32.xlu1 %v3268_v11, %s2989_s21  ;;  %v1870_v4 = vsel %vm91_vm1, %v1843_v62, %v3268_v11 }
 0x810   :  { %v634_v12 = vpop.permute.xlu1 %633 }
 0x811   :  { %v636_v14 = vmul.f32 %v2754_v59, %v634_v12  ;;  %v1828_v59 = vrot.slane %v3268_v11, 7  ;;  %v962_v12 = vld [vmem:[%s961_s0] sm:$0x1] }
 0x813   :  { %638 = vrot.lane.b32.xlu0 %v636_v14, %s2990_s22  ;;  %v1857_v3 = vsel %vm91_vm1, %v3217_v25, %v1828_v59  ;;  %v965_v25 = vld [vmem:[%s964_s16] sm:$0x1]  ;;  %s1395_s16 = scalar_lea.vmem %s3599_s1, %s2095_s30 }
 0x814   :  { %v967_v11 = vrot.slane %v965_v25, 7 }
 0x816   :  { %v969_v18 = vsel %vm91_vm1, %v962_v12, %v967_v11 }
 0x817   :  { %753 = vrot.lane.b32.xlu0 %v636_v14, %s2991_s6 }
 0x881   :  { %v643_v19 = vpop.permute.xlu1 %642 }
 0x885   :  { %v639_v20 = vpop.permute.xlu0 %638 }
 0x886   :  { %v645_v21 = vsel %vm203_vm4, %v639_v20, %v643_v19 }
 0x887   :  { %2344 = vmatmul.mubr.msk.f32.vlgmr.msra.gmra.mrb[4].mxu1 %vm211_vm5, %v645_v21 }
 0x888   :  { %2613 = vmatpush3.bf16.msra.mxu1 %v3103_v5  ;;  %2392 = vmatprep.mubr.msk.f32.mxu1 %vm2987_vm0, %v2988_v1 }
 0x889   :  { %v754_v23 = vpop.permute.xlu0 %753  ;;  %2614 = vmatprep.subr.bf16.mxu1 %v2986_v0 }
 0x88a   :  { %v756_v24 = vsel %vm93_vm2, %v752_v22, %v754_v23 }
 0x88b   :  { %2359 = vmatmul.mubr.msk.f32.vlgmr.msra.gmra.mrb[6].mxu0 %vm101_vm3, %v756_v24 }
 0x88c   :  { %2601 = vmatpush3.bf16.msra.mxu0 %v3149_v33  ;;  %2616 = vmatpush3.bf16.msra.mxu1 %v3112_v8 }
 0x88d   :  { %2602 = vmatprep.subr.bf16.mxu0 %v2986_v0  ;;  %2377 = vmatprep.mubr.msk.f32.mxu0 %vm2987_vm0, %v2988_v1 }
 0x88e   :  { %2617 = vmatprep.subr.bf16.mxu1 %v2986_v0 }
 0x890   :  { %2604 = vmatpush3.bf16.msra.mxu0 %v3152_v35  ;;  %2619 = vmatpush3.bf16.msra.mxu1 %v3122_v13 }
 0x891   :  { %2605 = vmatprep.subr.bf16.mxu0 %v2986_v0  ;;  %2620 = vmatprep.subr.bf16.mxu1 %v2986_v0 }
 0x894   :  { %2607 = vmatpush3.bf16.msra.mxu0 %v3156_v38 }
 0x895   :  { %2608 = vmatprep.subr.bf16.mxu0 %v2986_v0 }
 0x898   :  { %2610 = vmatpush3.bf16.msra.mxu0 %v3161_v42 }
 0x899   :  { %2632 = vmatprep.subr.bf16.mxu0 %v2986_v0 }
 0x95a   :  { %v715_v26 = vpop.f32.mrb[4].mxu1 }
 0x95b   :  { %v716_v27 = vadd.f32 %v3200_v53, %v715_v26  ;;  %v2345_v28 = vpop.f32.mrb[5].mxu1 }
 0x95d   :  { %2759 = vtanh.f32 %v716_v27  ;;  %v2076_v36 = vmul.f32 -1.442695, %v716_v27 }
 0x95e   :  { %v826_v29 = vpop.f32.mrb[6].mxu0 }
 0x95f   :  { %v827_v30 = vadd.f32 %v3141_v16, %v826_v29  ;;  %v2360_v31 = vpop.f32.mrb[7].mxu0 }
 0x961   :  { %2761 = vtanh.f32 %v827_v30  ;;  %v2080_v37 = vmul.f32 -1.442695, %v827_v30 }
 0x962   :  { %2763 = vpow2.f32 %v2076_v36 }
 0x963   :  { %2765 = vpow2.f32 %v2080_v37 }
 0x967   :  { %v2760_v32 = vpop.eup %2759 }
 0x968   :  { %728 = vrot.lane.b32.xlu1 %v2760_v32, %s2989_s21 }
 0x96b   :  { %v2762_v34 = vpop.eup %2761 }
 0x96c   :  { %839 = vrot.lane.b32.xlu0 %v2762_v34, %s2989_s21  ;;  %v2764_v39 = vpop.eup %2763 }
 0x96d   :  { %v722_v40 = vadd.f32 1.0, %v2764_v39  ;;  %v2766_v41 = vpop.eup %2765 }
 0x96e   :  { %v833_v43 = vadd.f32 1.0, %v2766_v41 }
 0x96f   :  { %2767 = vrcp.f32 %v722_v40 }
 0x970   :  { %2769 = vrcp.f32 %v833_v43 }
 0x979   :  { %v2768_v44 = vpop.eup %2767 }
 0x97a   :  { %v2770_v47 = vpop.eup %2769  ;;  %v726_v50 = vmul.f32 %v2768_v44, %v3259_v2 }
 0x97b   :  { %v837_v54 = vmul.f32 %v2770_v47, %v3263_v6 }
 0x9da   :  { %v729_v45 = vpop.permute.xlu1 %728 }
 0x9db   :  { %v731_v46 = vmul.f32 %v2768_v44, %v729_v45 }
 0x9dd   :  { %733 = vrot.lane.b32.xlu1 %v731_v46, %s2990_s22 }
 0x9de   :  { %v840_v48 = vpop.permute.xlu0 %839 }
 0x9df   :  { %v842_v49 = vmul.f32 %v2770_v47, %v840_v48 }
 0x9e1   :  { %844 = vrot.lane.b32.xlu0 %v842_v49, %s2990_s22 }
 0xa4f   :  { %v734_v51 = vpop.permute.xlu1 %733 }
 0xa50   :  { %v3310_v52 = vadd.f32 %v734_v51, %v726_v50 }
 0xa52   :  { %2771 = vtanh.f32 %v3310_v52 }
 0xa53   :  { %v845_v55 = vpop.permute.xlu0 %844 }
 0xa54   :  { %v3314_v56 = vadd.f32 %v845_v55, %v837_v54 }
 0xa56   :  { %2773 = vtanh.f32 %v3314_v56 }
 0xa5c   :  { %v2772_v57 = vpop.eup %2771 }
 0xa5d   :  { %739 = vrot.lane.b32.xlu1 %v2772_v57, %s2989_s21 }
 0xa60   :  { %v2774_v58 = vpop.eup %2773 }
 0xa61   :  { %850 = vrot.lane.b32.xlu0 %v2774_v58, %s2989_s21 }
 0xacf   :  { %v740_v60 = vpop.permute.xlu1 %739 }
 0xad0   :  { %v742_v61 = vmul.f32 %v2768_v44, %v740_v60 }
 0xad2   :  { %v1830_v63 = vrot.slane %v742_v61, 6  ;;  %v1845_v2 = vrot.slane %v742_v61, 7  ;;  %859 = vrot.lane.b32.xlu0 %v742_v61, %s2989_s21 }
 0xad3   :  { %v851_v6 = vpop.permute.xlu0 %850 }
 0xad4   :  { %v3326_v7 = vsel %vm1858_vm6, %v1857_v3, %v1830_v63  ;;  %v3328_v9 = vsel %vm1858_vm6, %v1870_v4, %v1845_v2  ;;  %v853_v10 = vmul.f32 %v2770_v47, %v851_v6  ;;  %v1182_v63 = vld [vmem:[%s1181_s23] sm:$0x1]  ;;  %s1612_s23 = scalar_lea.vmem %s3599_s1, %s2101_s18 }
 0xad5   :  { %v1184_v2 = vrot.slane %v1182_v63, 7  ;;  %v1179_v3 = vld [vmem:[%s1178_s26] sm:$0x1] }
 0xad6   :  { %855 = vrot.lane.b32.xlu1 %v853_v10, %s2990_s22 }
 0xada   :  { %970 = vrot.lane.b32.xlu1 %v853_v10, %s2991_s6 }
 0xb44   :  { %v860_v14 = vpop.permute.xlu0 %859 }
 0xb48   :  { %v856_v15 = vpop.permute.xlu1 %855 }
 0xb49   :  { %v862_v17 = vsel %vm203_vm4, %v856_v15, %v860_v14 }
 0xb4a   :  { %2378 = vmatmul.mubr.msk.f32.vlgmr.msra.gmra.mrb[8].mxu0 %vm211_vm5, %v862_v17 }
 0xb4b   :  { %2634 = vmatpush3.bf16.msra.mxu0 %v3103_v5  ;;  %2426 = vmatprep.mubr.msk.f32.mxu0 %vm2987_vm0, %v2988_v1 }
 0xb4c   :  { %v971_v19 = vpop.permute.xlu1 %970  ;;  %2635 = vmatprep.subr.bf16.mxu0 %v2986_v0 }
 0xb4d   :  { %v973_v20 = vsel %vm93_vm2, %v969_v18, %v971_v19 }
 0xb4e   :  { %2393 = vmatmul.mubr.msk.f32.vlgmr.msra.gmra.mrb[6].mxu1 %vm101_vm3, %v973_v20 }
 0xb4f   :  { %2622 = vmatpush3.bf16.msra.mxu1 %v3149_v33  ;;  %2637 = vmatpush3.bf16.msra.mxu0 %v3112_v8 }
 0xb50   :  { %2623 = vmatprep.subr.bf16.mxu1 %v2986_v0  ;;  %2411 = vmatprep.mubr.msk.f32.mxu1 %vm2987_vm0, %v2988_v1 }
 0xb51   :  { %2638 = vmatprep.subr.bf16.mxu0 %v2986_v0 }
 0xb53   :  { %2625 = vmatpush3.bf16.msra.mxu1 %v3152_v35  ;;  %2640 = vmatpush3.bf16.msra.mxu0 %v3122_v13 }
 0xb54   :  { %2626 = vmatprep.subr.bf16.mxu1 %v2986_v0  ;;  %2641 = vmatprep.subr.bf16.mxu0 %v2986_v0 }
 0xb57   :  { %2628 = vmatpush3.bf16.msra.mxu1 %v3156_v38 }
 0xb58   :  { %2629 = vmatprep.subr.bf16.mxu1 %v2986_v0 }
 0xb5b   :  { %2631 = vmatpush3.bf16.msra.mxu1 %v3161_v42 }
 0xb5c   :  { %2653 = vmatprep.subr.bf16.mxu1 %v2986_v0 }
 0xc1d   :  { %v932_v21 = vpop.f32.mrb[8].mxu0 }
 0xc1e   :  { %v933_v22 = vadd.f32 %v3200_v53, %v932_v21  ;;  %v2379_v23 = vpop.f32.mrb[9].mxu0 }
 0xc20   :  { %2775 = vtanh.f32 %v933_v22  ;;  %v2082_v30 = vmul.f32 -1.442695, %v933_v22 }
 0xc21   :  { %v1043_v24 = vpop.f32.mrb[6].mxu1 }
 0xc22   :  { %v1044_v26 = vadd.f32 %v3141_v16, %v1043_v24  ;;  %v2394_v27 = vpop.f32.mrb[7].mxu1 }
 0xc24   :  { %2777 = vtanh.f32 %v1044_v26  ;;  %v2086_v31 = vmul.f32 -1.442695, %v1044_v26 }
 0xc25   :  { %2779 = vpow2.f32 %v2082_v30 }
 0xc26   :  { %2781 = vpow2.f32 %v2086_v31 }
 0xc2a   :  { %v2776_v28 = vpop.eup %2775 }
 0xc2b   :  { %945 = vrot.lane.b32.xlu0 %v2776_v28, %s2989_s21 }
 0xc2e   :  { %v2778_v29 = vpop.eup %2777 }
 0xc2f   :  { %1056 = vrot.lane.b32.xlu1 %v2778_v29, %s2989_s21  ;;  %v2780_v32 = vpop.eup %2779 }
 0xc30   :  { %v939_v34 = vadd.f32 1.0, %v2780_v32  ;;  %v2782_v36 = vpop.eup %2781 }
 0xc31   :  { %v1050_v37 = vadd.f32 1.0, %v2782_v36 }
 0xc32   :  { %2783 = vrcp.f32 %v939_v34 }
 0xc33   :  { %2785 = vrcp.f32 %v1050_v37 }
 0xc3c   :  { %v2784_v39 = vpop.eup %2783 }
 0xc3d   :  { %v2786_v43 = vpop.eup %2785  ;;  %v943_v46 = vmul.f32 %v2784_v39, %v3310_v52 }
 0xc3e   :  { %v1054_v49 = vmul.f32 %v2786_v43, %v3314_v56 }
 0xc9d   :  { %v946_v40 = vpop.permute.xlu0 %945 }
 0xc9e   :  { %v948_v41 = vmul.f32 %v2784_v39, %v946_v40 }
 0xca0   :  { %950 = vrot.lane.b32.xlu0 %v948_v41, %s2990_s22 }
 0xca1   :  { %v1057_v44 = vpop.permute.xlu1 %1056 }
 0xca2   :  { %v1059_v45 = vmul.f32 %v2786_v43, %v1057_v44 }
 0xca4   :  { %1061 = vrot.lane.b32.xlu1 %v1059_v45, %s2990_s22 }
 0xd12   :  { %v951_v47 = vpop.permute.xlu0 %950 }
 0xd13   :  { %v3368_v48 = vadd.f32 %v951_v47, %v943_v46 }
 0xd15   :  { %2787 = vtanh.f32 %v3368_v48 }
 0xd16   :  { %v1062_v50 = vpop.permute.xlu1 %1061 }
 0xd17   :  { %v3372_v51 = vadd.f32 %v1062_v50, %v1054_v49 }
 0xd19   :  { %2789 = vtanh.f32 %v3372_v51 }
 0xd1f   :  { %v2788_v54 = vpop.eup %2787 }
 0xd20   :  { %956 = vrot.lane.b32.xlu0 %v2788_v54, %s2989_s21 }
 0xd23   :  { %v2790_v55 = vpop.eup %2789 }
 0xd24   :  { %1067 = vrot.lane.b32.xlu1 %v2790_v55, %s2989_s21 }
 0xd92   :  { %v957_v57 = vpop.permute.xlu0 %956 }
 0xd93   :  { %v959_v52 = vmul.f32 %v2784_v39, %v957_v57  ;;  %v1399_v57 = vld [vmem:[%s1398_s13] sm:$0x1] }
 0xd95   :  { %v1832_v58 = vrot.slane %v959_v52, 5  ;;  %v1847_v59 = vrot.slane %v959_v52, 6  ;;  %1076 = vrot.lane.b32.xlu1 %v959_v52, %s2989_s21  ;;  %v1401_v52 = vrot.slane %v1399_v57, 7 }
 0xd96   :  { %v1068_v60 = vpop.permute.xlu1 %1067 }
 0xd97   :  { %v3379_v56 = vsel %vm1860_vm7, %v3326_v7, %v1832_v58  ;;  %v3382_v61 = vsel %vm1860_vm7, %v3328_v9, %v1847_v59  ;;  %v1070_v62 = vmul.f32 %v2786_v43, %v1068_v60  ;;  %v1186_v9 = vsel %vm91_vm1, %v1179_v3, %v1184_v2  ;;  %v1396_v58 = vld [vmem:[%s1395_s16] sm:$0x1] }
 0xd99   :  { %1072 = vrot.lane.b32.xlu0 %v1070_v62, %s2990_s22 }
 0xd9d   :  { %1187 = vrot.lane.b32.xlu0 %v1070_v62, %s2991_s6 }
 0xe07   :  { %v1077_v4 = vpop.permute.xlu1 %1076 }
 0xe0b   :  { %v1073_v6 = vpop.permute.xlu0 %1072 }
 0xe0c   :  { %v1079_v7 = vsel %vm203_vm4, %v1073_v6, %v1077_v4 }
 0xe0d   :  { %2412 = vmatmul.mubr.msk.f32.vlgmr.msra.gmra.mrb[8].mxu1 %vm211_vm5, %v1079_v7 }
 0xe0e   :  { %2655 = vmatpush3.bf16.msra.mxu1 %v3103_v5  ;;  %2460 = vmatprep.mubr.msk.f32.mxu1 %vm2987_vm0, %v2988_v1 }
 0xe0f   :  { %v1188_v10 = vpop.permute.xlu0 %1187  ;;  %2656 = vmatprep.subr.bf16.mxu1 %v2986_v0 }
 0xe10   :  { %v1190_v25 = vsel %vm93_vm2, %v1186_v9, %v1188_v10 }
 0xe11   :  { %2427 = vmatmul.mubr.msk.f32.vlgmr.msra.gmra.mrb[10].mxu0 %vm101_vm3, %v1190_v25 }
 0xe12   :  { %2643 = vmatpush3.bf16.msra.mxu0 %v3149_v33  ;;  %2658 = vmatpush3.bf16.msra.mxu1 %v3112_v8 }
 0xe13   :  { %2644 = vmatprep.subr.bf16.mxu0 %v2986_v0  ;;  %2445 = vmatprep.mubr.msk.f32.mxu0 %vm2987_vm0, %v2988_v1 }
 0xe14   :  { %2659 = vmatprep.subr.bf16.mxu1 %v2986_v0 }
 0xe16   :  { %2646 = vmatpush3.bf16.msra.mxu0 %v3152_v35  ;;  %2661 = vmatpush3.bf16.msra.mxu1 %v3122_v13 }
 0xe17   :  { %2647 = vmatprep.subr.bf16.mxu0 %v2986_v0  ;;  %2662 = vmatprep.subr.bf16.mxu1 %v2986_v0 }
 0xe1a   :  { %2649 = vmatpush3.bf16.msra.mxu0 %v3156_v38 }
 0xe1b   :  { %2650 = vmatprep.subr.bf16.mxu0 %v2986_v0 }
 0xe1e   :  { %2652 = vmatpush3.bf16.msra.mxu0 %v3161_v42 }
 0xe1f   :  { %2674 = vmatprep.subr.bf16.mxu0 %v2986_v0 }
 0xee0   :  { %v1149_v11 = vpop.f32.mrb[8].mxu1 }
 0xee1   :  { %v1150_v12 = vadd.f32 %v3200_v53, %v1149_v11  ;;  %v2413_v14 = vpop.f32.mrb[9].mxu1 }
 0xee3   :  { %2791 = vtanh.f32 %v1150_v12  ;;  %v2088_v21 = vmul.f32 -1.442695, %v1150_v12 }
 0xee4   :  { %v1260_v15 = vpop.f32.mrb[10].mxu0 }
 0xee5   :  { %v1261_v17 = vadd.f32 %v3141_v16, %v1260_v15  ;;  %v2428_v18 = vpop.f32.mrb[11].mxu0 }
 0xee7   :  { %2793 = vtanh.f32 %v1261_v17  ;;  %v2092_v22 = vmul.f32 -1.442695, %v1261_v17 }
 0xee8   :  { %2795 = vpow2.f32 %v2088_v21 }
 0xee9   :  { %2797 = vpow2.f32 %v2092_v22 }
 0xeed   :  { %v2792_v19 = vpop.eup %2791 }
 0xeee   :  { %1162 = vrot.lane.b32.xlu1 %v2792_v19, %s2989_s21 }
 0xef1   :  { %v2794_v20 = vpop.eup %2793 }
 0xef2   :  { %1273 = vrot.lane.b32.xlu0 %v2794_v20, %s2989_s21  ;;  %v2796_v23 = vpop.eup %2795 }
 0xef3   :  { %v1156_v24 = vadd.f32 1.0, %v2796_v23  ;;  %v2798_v26 = vpop.eup %2797 }
 0xef4   :  { %v1267_v27 = vadd.f32 1.0, %v2798_v26 }
 0xef5   :  { %2799 = vrcp.f32 %v1156_v24 }
 0xef6   :  { %2801 = vrcp.f32 %v1267_v27 }
 0xeff   :  { %v2800_v28 = vpop.eup %2799 }
 0xf00   :  { %v2802_v31 = vpop.eup %2801  ;;  %v1160_v36 = vmul.f32 %v2800_v28, %v3368_v48 }
 0xf01   :  { %v1271_v40 = vmul.f32 %v2802_v31, %v3372_v51 }
 0xf60   :  { %v1163_v29 = vpop.permute.xlu1 %1162 }
 0xf61   :  { %v1165_v30 = vmul.f32 %v2800_v28, %v1163_v29 }
 0xf63   :  { %1167 = vrot.lane.b32.xlu1 %v1165_v30, %s2990_s22 }
 0xf64   :  { %v1274_v32 = vpop.permute.xlu0 %1273 }
 0xf65   :  { %v1276_v34 = vmul.f32 %v2802_v31, %v1274_v32 }
 0xf67   :  { %1278 = vrot.lane.b32.xlu0 %v1276_v34, %s2990_s22 }
 0xfd5   :  { %v1168_v37 = vpop.permute.xlu1 %1167 }
 0xfd6   :  { %v3422_v39 = vadd.f32 %v1168_v37, %v1160_v36 }
 0xfd8   :  { %2803 = vtanh.f32 %v3422_v39 }
 0xfd9   :  { %v1279_v41 = vpop.permute.xlu0 %1278 }
 0xfda   :  { %v3426_v43 = vadd.f32 %v1279_v41, %v1271_v40  ;;  %v1616_v41 = vld [vmem:[%s1615_s4] sm:$0x1] }
 0xfdc   :  { %2805 = vtanh.f32 %v3426_v43 }
 0xfe2   :  { %v2804_v44 = vpop.eup %2803 }
 0xfe3   :  { %1173 = vrot.lane.b32.xlu1 %v2804_v44, %s2989_s21  ;;  %v1613_v44 = vld [vmem:[%s1612_s23] sm:$0x1] }
 0xfe6   :  { %v2806_v45 = vpop.eup %2805 }
 0xfe7   :  { %1284 = vrot.lane.b32.xlu0 %v2806_v45, %s2989_s21 }
0x1055   :  { %v1174_v46 = vpop.permute.xlu1 %1173 }
0x1056   :  { %v1176_v47 = vmul.f32 %v2800_v28, %v1174_v46 }
0x1058   :  { %v1834_v48 = vrot.slane %v1176_v47, 4  ;;  %v1849_v49 = vrot.slane %v1176_v47, 5  ;;  %1293 = vrot.lane.b32.xlu0 %v1176_v47, %s2989_s21 }
0x1059   :  { %v1285_v50 = vpop.permute.xlu0 %1284 }
0x105a   :  { %v1287_v51 = vmul.f32 %v2802_v31, %v1285_v50  ;;  %v3433_v54 = vsel %vm1862_vm8, %v3382_v61, %v1849_v49  ;;  %v3436_v55 = vsel %vm1862_vm8, %v3379_v56, %v1834_v48  ;;  %v1403_v61 = vsel %vm91_vm1, %v1396_v58, %v1401_v52 }
0x105c   :  { %1289 = vrot.lane.b32.xlu1 %v1287_v51, %s2990_s22 }
0x1060   :  { %1404 = vrot.lane.b32.xlu1 %v1287_v51, %s2991_s6 }
0x10ca   :  { %v1294_v59 = vpop.permute.xlu0 %1293 }
0x10ce   :  { %v1290_v60 = vpop.permute.xlu1 %1289 }
0x10cf   :  { %v1296_v56 = vsel %vm203_vm4, %v1290_v60, %v1294_v59 }
0x10d0   :  { %2446 = vmatmul.mubr.msk.f32.vlgmr.msra.gmra.mrb[12].mxu0 %vm211_vm5, %v1296_v56 }
0x10d1   :  { %2676 = vmatpush3.bf16.msra.mxu0 %v3103_v5  ;;  %2494 = vmatprep.mubr.msk.f32.mxu0 %vm2987_vm0, %v2988_v1 }
0x10d2   :  { %v1405_v62 = vpop.permute.xlu1 %1404  ;;  %2677 = vmatprep.subr.bf16.mxu0 %v2986_v0 }
0x10d3   :  { %v1407_v63 = vsel %vm93_vm2, %v1403_v61, %v1405_v62 }
0x10d4   :  { %2461 = vmatmul.mubr.msk.f32.vlgmr.msra.gmra.mrb[10].mxu1 %vm101_vm3, %v1407_v63 }
0x10d5   :  { %2664 = vmatpush3.bf16.msra.mxu1 %v3149_v33  ;;  %2679 = vmatpush3.bf16.msra.mxu0 %v3112_v8 }
0x10d6   :  { %2665 = vmatprep.subr.bf16.mxu1 %v2986_v0  ;;  %2479 = vmatprep.mubr.msk.f32.mxu1 %vm2987_vm0, %v2988_v1 }
0x10d7   :  { %2680 = vmatprep.subr.bf16.mxu0 %v2986_v0 }
0x10d9   :  { %2667 = vmatpush3.bf16.msra.mxu1 %v3152_v35  ;;  %2682 = vmatpush3.bf16.msra.mxu0 %v3122_v13 }
0x10da   :  { %2668 = vmatprep.subr.bf16.mxu1 %v2986_v0  ;;  %2683 = vmatprep.subr.bf16.mxu0 %v2986_v0 }
0x10dd   :  { %2670 = vmatpush3.bf16.msra.mxu1 %v3156_v38 }
0x10de   :  { %2671 = vmatprep.subr.bf16.mxu1 %v2986_v0 }
0x10e1   :  { %2673 = vmatpush3.bf16.msra.mxu1 %v3161_v42 }
0x11a3   :  { %v1366_v5 = vpop.f32.mrb[12].mxu0 }
0x11a4   :  { %v1367_v8 = vadd.f32 %v3200_v53, %v1366_v5  ;;  %v2447_v2 = vpop.f32.mrb[13].mxu0 }
0x11a6   :  { %2807 = vtanh.f32 %v1367_v8  ;;  %v2094_v9 = vmul.f32 -1.442695, %v1367_v8 }
0x11a7   :  { %v1477_v3 = vpop.f32.mrb[10].mxu1 }
0x11a8   :  { %v1478_v4 = vadd.f32 %v3141_v16, %v1477_v3  ;;  %v2462_v6 = vpop.f32.mrb[11].mxu1 }
0x11aa   :  { %2809 = vtanh.f32 %v1478_v4  ;;  %v2098_v10 = vmul.f32 -1.442695, %v1478_v4 }
0x11ab   :  { %2811 = vpow2.f32 %v2094_v9 }
0x11ac   :  { %2813 = vpow2.f32 %v2098_v10 }
0x11b0   :  { %v2808_v13 = vpop.eup %2807 }
0x11b1   :  { %1379 = vrot.lane.b32.xlu0 %v2808_v13, %s2989_s21 }
0x11b4   :  { %v2810_v7 = vpop.eup %2809 }
0x11b5   :  { %1490 = vrot.lane.b32.xlu1 %v2810_v7, %s2989_s21  ;;  %v2812_v25 = vpop.eup %2811 }
0x11b6   :  { %v1373_v11 = vadd.f32 1.0, %v2812_v25  ;;  %v2814_v12 = vpop.eup %2813 }
0x11b7   :  { %v1484_v14 = vadd.f32 1.0, %v2814_v12 }
0x11b8   :  { %2815 = vrcp.f32 %v1373_v11 }
0x11b9   :  { %2817 = vrcp.f32 %v1484_v14 }
0x11c2   :  { %v2816_v15 = vpop.eup %2815 }
0x11c3   :  { %v2818_v18 = vpop.eup %2817  ;;  %v1377_v21 = vmul.f32 %v2816_v15, %v3422_v39 }
0x11c4   :  { %v1488_v24 = vmul.f32 %v2818_v18, %v3426_v43  ;;  %v1618_v43 = vrot.slane %v1616_v41, 7  ;;  %v1877_v41 = vld [vmem:[#allocation7] sm:$0xff] }
0x11c6   :  { %v1620_v48 = vsel %vm91_vm1, %v1613_v44, %v1618_v43  ;;  %v1878_v43 = vld [vmem:[#allocation7 + $0x8] sm:$0xff]  ;;  %v1879_v44 = vld [vmem:[#allocation7 + $0x10] sm:$0xff] }
0x1223   :  { %v1380_v16 = vpop.permute.xlu0 %1379 }
0x1224   :  { %v1382_v17 = vmul.f32 %v2816_v15, %v1380_v16 }
0x1226   :  { %1384 = vrot.lane.b32.xlu0 %v1382_v17, %s2990_s22 }
0x1227   :  { %v1491_v19 = vpop.permute.xlu1 %1490 }
0x1228   :  { %v1493_v20 = vmul.f32 %v2818_v18, %v1491_v19 }
0x122a   :  { %1495 = vrot.lane.b32.xlu1 %v1493_v20, %s2990_s22 }
0x1298   :  { %v1385_v22 = vpop.permute.xlu0 %1384 }
0x1299   :  { %v3475_v23 = vadd.f32 %v1385_v22, %v1377_v21 }
0x129b   :  { %2819 = vtanh.f32 %v3475_v23 }
0x129c   :  { %v1496_v26 = vpop.permute.xlu1 %1495 }
0x129d   :  { %v3479_v27 = vadd.f32 %v1496_v26, %v1488_v24 }
0x129f   :  { %2821 = vtanh.f32 %v3479_v27 }
0x12a5   :  { %v2820_v28 = vpop.eup %2819 }
0x12a6   :  { %1390 = vrot.lane.b32.xlu0 %v2820_v28, %s2989_s21 }
0x12a9   :  { %v2822_v29 = vpop.eup %2821 }
0x12aa   :  { %1501 = vrot.lane.b32.xlu1 %v2822_v29, %s2989_s21 }
0x1318   :  { %v1391_v30 = vpop.permute.xlu0 %1390 }
0x1319   :  { %v1393_v31 = vmul.f32 %v2816_v15, %v1391_v30 }
0x131b   :  { %v1836_v32 = vrot.slane %v1393_v31, 3  ;;  %v1851_v34 = vrot.slane %v1393_v31, 4  ;;  %1510 = vrot.lane.b32.xlu1 %v1393_v31, %s2989_s21 }
0x131c   :  { %v1502_v36 = vpop.permute.xlu1 %1501 }
0x131d   :  { %v1504_v37 = vmul.f32 %v2818_v18, %v1502_v36  ;;  %v3486_v39 = vsel %vm1864_vm9, %v3433_v54, %v1851_v34  ;;  %v3489_v40 = vsel %vm1864_vm9, %v3436_v55, %v1836_v32 }
0x131f   :  { %1506 = vrot.lane.b32.xlu0 %v1504_v37, %s2990_s22 }
0x1323   :  { %1621 = vrot.lane.b32.xlu0 %v1504_v37, %s2991_s6 }
0x138d   :  { %v1511_v45 = vpop.permute.xlu1 %1510 }
0x1391   :  { %v1507_v46 = vpop.permute.xlu0 %1506 }
0x1392   :  { %v1513_v47 = vsel %vm203_vm4, %v1507_v46, %v1511_v45  ;;  %v2695_v45 = vpack.c.bf16 %v1878_v43, %v1877_v41  ;;  %v1880_v46 = vld [vmem:[#allocation7 + $0x18] sm:$0xff] }
0x1393   :  { %2480 = vmatmul.mubr.msk.f32.vlgmr.msra.gmra.mrb[12].mxu1 %vm211_vm5, %v1513_v47  ;;  %v2699_v47 = vpack.c.bf16 %v1880_v46, %v1879_v44 }
0x1394   :  { %2696 = vmatprep.subr.bf16.mxu1 %v2695_v45 }
0x1395   :  { %v1622_v49 = vpop.permute.xlu0 %1621  ;;  %2698 = vmatpush3.bf16.msra.mxu1 %v2695_v45 }
0x1396   :  { %v1624_v50 = vsel %vm93_vm2, %v1620_v48, %v1622_v49  ;;  %2700 = vmatprep.subr.bf16.mxu1 %v2699_v47 }
0x1397   :  { %2495 = vmatmul.mubr.msk.f32.vlgmr.msra.gmra.mrb[14].mxu0 %vm101_vm3, %v1624_v50 }
0x1398   :  { %2685 = vmatpush3.bf16.msra.mxu0 %v3149_v33  ;;  %2513 = vmatprep.mubr.msk.f32.mxu0 %vm2987_vm0, %v2988_v1  ;;  %v2847_v1 = vld [vmem:[%s3601_s3] ss:$0 sm:$0xff] }
0x1399   :  { %2686 = vmatprep.subr.bf16.mxu0 %v2986_v0  ;;  %2702 = vmatpush3.bf16.msra.mxu1 %v2699_v47 }
0x139c   :  { %2688 = vmatpush3.bf16.msra.mxu0 %v3152_v35 }
0x139d   :  { %2689 = vmatprep.subr.bf16.mxu0 %v2986_v0 }
0x13a0   :  { %2691 = vmatpush3.bf16.msra.mxu0 %v3156_v38 }
0x13a1   :  { %2692 = vmatprep.subr.bf16.mxu0 %v2986_v0 }
0x13a4   :  { %2694 = vmatpush3.bf16.msra.mxu0 %v3161_v42 }
0x1466   :  { %v1583_v51 = vpop.f32.mrb[12].mxu1 }
0x1467   :  { %v1584_v54 = vadd.f32 %v3200_v53, %v1583_v51  ;;  %v2481_v55 = vpop.f32.mrb[13].mxu1 }
0x1469   :  { %2823 = vtanh.f32 %v1584_v54  ;;  %v2100_v0 = vmul.f32 -1.442695, %v1584_v54 }
0x146a   :  { %v1694_v33 = vpop.f32.mrb[14].mxu0 }
0x146b   :  { %v1695_v57 = vadd.f32 %v2847_v1, %v1694_v33  ;;  %v2496_v35 = vpop.f32.mrb[15].mxu0 }
0x146d   :  { %2825 = vtanh.f32 %v1695_v57  ;;  %v2104_v42 = vmul.f32 -1.442695, %v1695_v57 }
0x146e   :  { %2827 = vpow2.f32 %v2100_v0 }
0x146f   :  { %2829 = vpow2.f32 %v2104_v42 }
0x1473   :  { %v2824_v52 = vpop.eup %2823 }
0x1474   :  { %1596 = vrot.lane.b32.xlu1 %v2824_v52, %s2989_s21 }
0x1477   :  { %v2826_v38 = vpop.eup %2825 }
0x1478   :  { %1707 = vrot.lane.b32.xlu0 %v2826_v38, %s2989_s21  ;;  %v2828_v53 = vpop.eup %2827 }
0x1479   :  { %v1590_v58 = vadd.f32 1.0, %v2828_v53  ;;  %v2830_v59 = vpop.eup %2829 }
0x147a   :  { %v1701_v60 = vadd.f32 1.0, %v2830_v59 }
0x147b   :  { %2831 = vrcp.f32 %v1590_v58 }
0x147c   :  { %2833 = vrcp.f32 %v1701_v60 }
0x1485   :  { %v2832_v56 = vpop.eup %2831 }
0x1486   :  { %v2834_v63 = vpop.eup %2833  ;;  %v1594_v2 = vmul.f32 %v2832_v56, %v3475_v23  ;;  %v2848_v23 = vld [vmem:[%s3603_s5] ss:$0 sm:$0xff]  ;;  %s2992_s5 = smov 96  }
0x1487   :  { %v1705_v6 = vmul.f32 %v2834_v63, %v3479_v27 }
0x14e6   :  { %v1597_v61 = vpop.permute.xlu1 %1596 }
0x14e7   :  { %v1599_v62 = vmul.f32 %v2832_v56, %v1597_v61 }
0x14e9   :  { %1601 = vrot.lane.b32.xlu1 %v1599_v62, %s2990_s22 }
0x14ea   :  { %v1708_v5 = vpop.permute.xlu0 %1707 }
0x14eb   :  { %v1710_v8 = vmul.f32 %v2834_v63, %v1708_v5 }
0x14ed   :  { %1712 = vrot.lane.b32.xlu0 %v1710_v8, %s2990_s22 }
0x155b   :  { %v1602_v3 = vpop.permute.xlu1 %1601 }
0x155c   :  { %v1604_v4 = vadd.f32 %v1602_v3, %v1594_v2 }
0x155e   :  { %2835 = vtanh.f32 %v1604_v4 }
0x155f   :  { %v1713_v13 = vpop.permute.xlu0 %1712 }
0x1560   :  { %v3523_v7 = vadd.f32 %v1713_v13, %v1705_v6 }
0x1562   :  { %2837 = vtanh.f32 %v3523_v7 }
0x1568   :  { %v2836_v9 = vpop.eup %2835 }
0x1569   :  { %1607 = vrot.lane.b32.xlu1 %v2836_v9, %s2989_s21 }
0x156c   :  { %v2838_v10 = vpop.eup %2837 }
0x156d   :  { %1718 = vrot.lane.b32.xlu0 %v2838_v10, %s2989_s21 }
0x15db   :  { %v1608_v25 = vpop.permute.xlu1 %1607 }
0x15dc   :  { %v1610_v11 = vmul.f32 %v2832_v56, %v1608_v25 }
0x15de   :  { %v1838_v12 = vrot.slane %v1610_v11, 2  ;;  %v1853_v14 = vrot.slane %v1610_v11, 3  ;;  %1727 = vrot.lane.b32.xlu0 %v1610_v11, %s2989_s21 }
0x15df   :  { %v1719_v15 = vpop.permute.xlu0 %1718 }
0x15e0   :  { %v1721_v16 = vmul.f32 %v2834_v63, %v1719_v15  ;;  %v1875_v17 = vsel %vm1866_vm10, %v3486_v39, %v1853_v14  ;;  %v1867_v18 = vsel %vm1866_vm10, %v3489_v40, %v1838_v12 }
0x15e2   :  { %1723 = vrot.lane.b32.xlu1 %v1721_v16, %s2990_s22 }
0x1650   :  { %v1728_v19 = vpop.permute.xlu0 %1727 }
0x1654   :  { %v1724_v20 = vpop.permute.xlu1 %1723 }
0x1655   :  { %v1730_v21 = vsel %vm203_vm4, %v1724_v20, %v1728_v19  ;;  %1976 = vst.msk [vmem:[#allocation10] sm:$0x3] %vm1975_vm11, %v1724_v20 }
0x1656   :  { %2514 = vmatmul.mubr.msk.f32.vlgmr.msra.gmra.mrb[16].mxu0 %vm211_vm5, %v1730_v21 }
0x1729   :  { %v1800_v22 = vpop.f32.mrb[16].mxu0 }
0x172a   :  { %v1801_v24 = vadd.f32 %v2848_v23, %v1800_v22  ;;  %v2515_v26 = vpop.f32.mrb[17].mxu0 }
0x172c   :  { %2839 = vtanh.f32 %v1801_v24  ;;  %v2106_v28 = vmul.f32 -1.442695, %v1801_v24 }
0x172e   :  { %2841 = vpow2.f32 %v2106_v28 }
0x1736   :  { %v2840_v27 = vpop.eup %2839 }
0x1737   :  { %1813 = vrot.lane.b32.xlu1 %v2840_v27, %s2989_s21 }
0x1738   :  { %v2842_v29 = vpop.eup %2841 }
0x1739   :  { %v1807_v30 = vadd.f32 1.0, %v2842_v29 }
0x173b   :  { %2843 = vrcp.f32 %v1807_v30 }
0x1745   :  { %v2844_v31 = vpop.eup %2843 }
0x1746   :  { %v1811_v36 = vmul.f32 %v2844_v31, %v1604_v4 }
0x17a9   :  { %v1814_v32 = vpop.permute.xlu1 %1813 }
0x17aa   :  { %v1816_v34 = vmul.f32 %v2844_v31, %v1814_v32 }
0x17ac   :  { %1818 = vrot.lane.b32.xlu0 %v1816_v34, %s2990_s22 }
0x181e   :  { %v1819_v37 = vpop.permute.xlu0 %1818 }
0x181f   :  { %v1821_v39 = vadd.f32 %v1819_v37, %v1811_v36 }
0x1821   :  { %2845 = vtanh.f32 %v1821_v39 }
0x182b   :  { %v2846_v40 = vpop.eup %2845 }
0x182c   :  { %1824 = vrot.lane.b32.xlu1 %v2846_v40, %s2989_s21  ;;  %s2993_s21 = smov [#allocation10]  }
0x182d   :  { %s2010_s25 = sshll.u32 %s2993_s21, 4  ;;  %s2011_s25 = int_to_ptr.vmem [resolvable:$true] %s2010_s25 }
0x182e   :  { %s2905_s26 = scalar_lea.vmem %s2011_s25, 64  ;;  %p2910_p8 = scmp.lt.s32.totalorder %s2011_s25, %s2011_s25 }
0x182f   :  { %p2906_p7 = scmp.ne.s32.totalorder %s2011_s25, %s2905_s26  ;;  %p2911_p9 = scmp.lt.s32.totalorder %s2905_s26, %s2905_s26 }
0x1831   :  { %p2912_p10 = por %p2911_p9, %p2910_p8 }
0x1833   :  { %p2913_p11 = pnand %p2912_p10, %p2906_p7 }
0x189e   :  { %v1825_v48 = vpop.permute.xlu1 %1824 }
0x189f   :  { %v1827_v49 = vmul.f32 %v2844_v31, %v1825_v48 }
0x18a1   :  { %v1841_v50 = vrot.slane %v1827_v49, 1  ;;  %v1855_v51 = vrot.slane %v1827_v49, 2 }
0x18a3   :  { %v1876_v54 = vsel %vm1868_vm12, %v1875_v17, %v1855_v51  ;;  %v1869_v55 = vsel %vm1868_vm12, %v1867_v18, %v1841_v50 }
0x18a4   :  { %1892 = vrot.lane.b32.xlu1 %v1876_v54, %s2990_s22  ;;  %1890 = vrot.lane.b32.xlu0 %v1869_v55, %s2990_s22 }
0x18a8   :  { %1983 = vrot.lane.b32.xlu1 %v3523_v7, %s2992_s5  ;;  %1977 = vrot.lane.b32.xlu0 %v1827_v49, %s2990_s22 }
0x18ac   :  { %1988 = vrot.lane.b32.xlu0 %v1821_v39, %s2992_s5 }
0x1916   :  { %v1893_v33 = vpop.permute.xlu1 %1892  ;;  %v1891_v1 = vpop.permute.xlu0 %1890 }
0x1917   :  { %2524 = vmatprep.mubr.msk.f32.mxu1 %vm203_vm4, %v1891_v1 }
0x1918   :  { %2525 = vmatmul.mubr.msk.f32.vlgmr.msra.gmra.mrb[14].mxu1 %vm203_vm4, %v1893_v33 }
0x191a   :  { %v1984_v57 = vpop.permute.xlu1 %1983  ;;  %v1978_v35 = vpop.permute.xlu0 %1977 }
0x191b   :  { %1986 = vst.msk [vmem:[#allocation12] sm:$0x3] %vm1975_vm11, %v1984_v57  ;;  %1981 = vst.msk [vmem:[#allocation10 + $0x2] sm:$0x3] %vm1975_vm11, %v1978_v35 }
0x191e   :  { %v1989_v52 = vpop.permute.xlu0 %1988 }
0x191f   :  { %1992 = vst.msk [vmem:[#allocation12 + $0x2] sm:$0x3] %vm1975_vm11, %v1989_v52 }
0x1920   :  { %2916 = shalt.err (!%p2913_p11)
}
0x1921   :  { %s2917_s11 = scalar_lea.hbm %s3607_s9, 64 }
0x1922   :  { %p2918_p12 = scmp.ne.s32.totalorder %s3607_s9, %s2917_s11  ;;  %p2921_p13 = scmp.lt.u32.totalorder %s2917_s11, %s3607_s9 }
0x1924   :  { %p2923_p0 = pnand %p2921_p13, %p2918_p12 }
0x1926   :  { %2926 = shalt.err (!%p2923_p0)
}
0x1927   :  { %s2994_s16 = smov 2   ;;  %s2995_s0 = smov [#allocation12]  }
0x1928   :  { %2016 = dma.vmem_to_hbm [thread:$0]  %s2011_s25, 64, %s3607_s9, [#allocation11], %s2990_s22, %s2990_s22, %s2994_s16  }
0x1929   :  { %s2022_s20 = sshll.u32 %s2995_s0, 4  ;;  %s2023_s20 = int_to_ptr.vmem [resolvable:$true] %s2022_s20 }
0x192a   :  { %s2927_s4 = scalar_lea.vmem %s2023_s20, 64  ;;  %p2932_p2 = scmp.lt.s32.totalorder %s2023_s20, %s2023_s20 }
0x192b   :  { %p2928_p1 = scmp.ne.s32.totalorder %s2023_s20, %s2927_s4  ;;  %p2933_p3 = scmp.lt.s32.totalorder %s2927_s4, %s2927_s4 }
0x192d   :  { %p2934_p4 = por %p2933_p3, %p2932_p2 }
0x192f   :  { %p2935_p5 = pnand %p2934_p4, %p2928_p1 }
0x1931   :  { %2938 = shalt.err (!%p2935_p5)
}
0x1932   :  { %s2939_s23 = scalar_lea.hbm %s3608_s10, 64 }
0x1933   :  { %p2940_p6 = scmp.ne.s32.totalorder %s3608_s10, %s2939_s23  ;;  %p2943_p7 = scmp.lt.u32.totalorder %s2939_s23, %s3608_s10 }
0x1935   :  { %p2945_p8 = pnand %p2943_p7, %p2940_p6 }
0x1937   :  { %2948 = shalt.err (!%p2945_p8)
}
0x1938   :  { %2028 = dma.vmem_to_hbm [thread:$0]  %s2023_s20, 64, %s3608_s10, [#allocation11], %s2990_s22, %s2990_s22, %s2994_s16  }
0x1939   :  { %v2107_v38 = vld [vmem:[%s3605_s7] ss:$0 sm:$0xff]  ;;  %s2996_s26 = smov [#allocation9]  }
0x193a   :  { %s1998_s29 = sshll.u32 %s2996_s26, 4  ;;  %s1999_s29 = int_to_ptr.vmem [resolvable:$true] %s1998_s29 }
0x193b   :  { %s2949_s30 = scalar_lea.vmem %s1999_s29, 256  ;;  %p2954_p10 = scmp.lt.s32.totalorder %s1999_s29, %s1999_s29 }
0x193c   :  { %p2950_p9 = scmp.ne.s32.totalorder %s1999_s29, %s2949_s30  ;;  %p2955_p11 = scmp.lt.s32.totalorder %s2949_s30, %s2949_s30 }
0x193e   :  { %p2956_p12 = por %p2955_p11, %p2954_p10 }
0x1940   :  { %p2957_p13 = pnand %p2956_p12, %p2950_p9 }
0x19eb   :  { %v2526_v0 = vpop.f32.mrb[14].mxu1 }
0x19ec   :  { %v1970_v42 = vadd.f32 %v2526_v0, %v2107_v38  ;;  %v1964_v53 = vpop.f32.mrb[15].mxu1 }
0x19ed   :  { %v1965_v58 = vadd.f32 %v2107_v38, %v1964_v53 }
0x19ee   :  { %1974 = vst.msk [vmem:[#allocation9 + $0x8] sm:$0xff] %vm203_vm4, %v1970_v42 }
0x19ef   :  { %1973 = vst.msk [vmem:[#allocation9] sm:$0xff] %vm203_vm4, %v1965_v58 }
0x19f0   :  { %2960 = shalt.err (!%p2957_p13)
}
0x19f1   :  { %s2961_s22 = scalar_lea.hbm %s3606_s8, 256 }
0x19f2   :  { %p2962_p0 = scmp.ne.s32.totalorder %s3606_s8, %s2961_s22  ;;  %p2965_p1 = scmp.lt.u32.totalorder %s2961_s22, %s3606_s8 }
0x19f4   :  { %p2967_p2 = pnand %p2965_p1, %p2962_p0 }
0x19f6   :  { %2970 = shalt.err (!%p2967_p2)
}
0x19f7   :  { %2004 = dma.vmem_to_hbm [thread:$0]  %s1999_s29, 256, %s3606_s8, [#allocation6], %s2983_s27, %s2983_s27, %s2984_s28  }
0x19f8   :  { %2977 = dma.done.wait [#allocation6], 256  }
0x19f9   :  { %2978 = vsyncadd [#allocation6], 4294967040 }
0x19fa   :  { %2979 = dma.done.wait [#allocation11], 128  }
0x19fb   :  { %2980 = vsyncadd [#allocation11], 4294967168 }
0x19fc   :  { %2038 = vsyncpa [#allocation5], 1 }
0x19fd   :  { %2039 = vsyncpa [#allocation8], 1 }
0x19fe   :  { %2040 = vsyncpa [#allocation6], 1 }
0x19ff   :  { %2041 = vsyncpa [#allocation11], 1 }

</bundles_post_ra>
